<compile_context>
chip_gen: v6e
topology: v6e:2x2x1
jax: 0.10.0
libtpu: 0.0.40
codegen_flags: <defaults>
</compile_context>

<pallas_src>
import functools

import jax
import jax.numpy as jnp
from jax.experimental import pallas as pl
from jax.experimental.pallas import tpu as pltpu

# -------------------- hyper-parameters (small, synthetic) --------------------
HYP = dict(
    d_model=32, orig_d_l=16, orig_d_a=12, orig_d_v=20,
    num_heads=4, layers=2, output_dim=8,
    attn_dropout=0.0, relu_dropout=0.0, res_dropout=0.0,
    out_dropout=0.0, embed_dropout=0.0,
)
BATCH, SEQ = 2, 8
D_IN_PAD = 32        # common (zero-padded) input feature width for all modalities
N_MOD = 3            # modalities stacked in order (t, a, v)


# ------------------------------ fused Pallas kernel ---------------------------
def _superformer_kernel(x_ref, w_in_ref, b_in_ref, wqkv_ref, bqkv_ref,
                        wo_ref, bo_ref, w1_ref, b1_ref, w2_ref, b2_ref,
                        p1w_ref, p1b_ref, p2w_ref, p2b_ref, outw_ref, outb_ref,
                        out_ref, last_ref,
                        *, batch, seq, d_model, num_heads, n_layers):
    """One grid step == one modality's full encoder; last step also runs the head."""
    m = pl.program_id(0)
    dh = d_model // num_heads
    scale = 1.0 / float(dh) ** 0.5
    rows = batch * seq

    # ---- input projection (padded input cols hit zero weight rows -> exact) ----
    h = (jnp.dot(x_ref[0], w_in_ref[0], preferred_element_type=jnp.float32)
         + b_in_ref[0])                                              # [rows, d]

    for l in range(n_layers):
        # ---- multi-head self-attention (fused QKV; per-head Wo fold, no concat) ----
        qkv = (jnp.dot(h, wqkv_ref[0, l], preferred_element_type=jnp.float32)
               + bqkv_ref[0, l])                                     # [rows, 3d]
        qkv3 = qkv.reshape(batch, seq, 3 * d_model)
        wo_l = wo_ref[0, l]                                          # [d, d]
        attn_out = bo_ref[0, l]                                      # (1, d), broadcasts
        for hh in range(num_heads):
            q = qkv3[:, :, hh * dh:(hh + 1) * dh]                    # [B, L, dh]
            k = qkv3[:, :, d_model + hh * dh:d_model + (hh + 1) * dh]
            v = qkv3[:, :, 2 * d_model + hh * dh:2 * d_model + (hh + 1) * dh]
            s = jnp.einsum('bqd,bkd->bqk', q, k,
                           preferred_element_type=jnp.float32) * scale
            s = s - jnp.max(s, axis=-1, keepdims=True)
            p = jnp.exp(s)
            p = p * pl.reciprocal(jnp.sum(p, axis=-1, keepdims=True), approx=True)
            ctx = jnp.einsum('bqk,bkd->bqd', p, v,
                             preferred_element_type=jnp.float32)     # [B, L, dh]
            # fold this head straight into the output projection (no lane concat)
            attn_out = attn_out + jnp.dot(ctx.reshape(rows, dh),
                                          wo_l[hh * dh:(hh + 1) * dh, :],
                                          preferred_element_type=jnp.float32)
        h = h + attn_out                                             # residual

        # ---- feed-forward + residual (f32 throughout) ----
        hf = jnp.maximum(
            jnp.dot(h, w1_ref[0, l], preferred_element_type=jnp.float32)
            + b1_ref[0, l], 0.0)
        h = h + (jnp.dot(hf, w2_ref[0, l], preferred_element_type=jnp.float32)
                 + b2_ref[0, l])

    # only the last timestep is consumed downstream (PyTorch h_x[-1])
    h_last = h.reshape(batch, seq, d_model)[:, seq - 1, :]           # [B, d]

    # park this modality's last state in the persistent VMEM scratch
    # (static per-modality branches; avoids a dynamic-index store)
    for mm in range(N_MOD):
        @pl.when(m == mm)
        def _(mm=mm):
            last_ref[mm] = h_last

    # ---- head MLP, fused into the final grid step ----
    @pl.when(m == pl.num_programs(0) - 1)
    def _():
        # concat([h_t[-1], h_a[-1], h_v[-1]], dim=1); single tiny lane concat
        last_hs = jnp.concatenate([last_ref[0], last_ref[1], last_ref[2]],
                                  axis=-1)                           # [B, 3d]
        h1 = jnp.maximum(
            jnp.dot(last_hs, p1w_ref[...], preferred_element_type=jnp.float32)
            + p1b_ref[...], 0.0)
        z2 = (jnp.dot(h1, p2w_ref[...], preferred_element_type=jnp.float32)
              + p2b_ref[...] + last_hs)                              # + residual
        out = (jnp.dot(z2, outw_ref[...], preferred_element_type=jnp.float32)
               + outb_ref[...])
        out_ref[...] = out.astype(out_ref.dtype)


# ------------------------------ Pallas wrapper --------------------------------
def superformer_pallas(params, xs):
    """xs: [3, B*L, D_IN_PAD] stacked (t, a, v); returns [B, output_dim]."""
    b, l = BATCH, SEQ
    d = HYP['d_model']
    nout = HYP['output_dim']

    kern = functools.partial(
        _superformer_kernel, batch=b, seq=l, d_model=d,
        num_heads=HYP['num_heads'], n_layers=HYP['layers'])

    def mod_spec(arr):           # per-modality stacked arrays: block over axis 0
        nrest = arr.ndim - 1
        return pl.BlockSpec((1,) + arr.shape[1:],
                            lambda m, _n=nrest: (m,) + (0,) * _n)

    def full_spec(arr):          # shared head weights: full array every step
        nd = arr.ndim
        return pl.BlockSpec(arr.shape, lambda m, _n=nd: (0,) * _n)

    mod_ops = (xs, params['w_in'], params['b_in'], params['wqkv'], params['bqkv'],
               params['wo'], params['bo'], params['w1'], params['b1'],
               params['w2'], params['b2'])
    head_ops = (params['p1_w'], params['p1_b'], params['p2_w'], params['p2_b'],
                params['out_w'], params['out_b'])

    return pl.pallas_call(
        kern,
        out_shape=jax.ShapeDtypeStruct((b, nout), jnp.float32),
        grid=(N_MOD,),
        in_specs=[mod_spec(op) for op in mod_ops] + [full_spec(op) for op in head_ops],
        out_specs=pl.BlockSpec((b, nout), lambda m: (0, 0)),
        scratch_shapes=[pltpu.VMEM((N_MOD, b, d), jnp.float32)],
        compiler_params=pltpu.CompilerParams(
            dimension_semantics=("arbitrary",)),   # last step depends on prior steps
    )(*mod_ops, *head_ops)


# ----------------------------- parameter set-up ------------------------------
class _KeyGen:
    def __init__(self, key):
        self._key = key

    def __call__(self):
        self._key, sub = jax.random.split(self._key)
        return sub


def init_params(key):
    kg = _KeyGen(key)
    d = HYP['d_model']
    dff = 4 * d
    nl = HYP['layers']
    nout = HYP['output_dim']
    c = 3 * d

    def w(shape):
        return 0.02 * jax.random.normal(kg(), shape, dtype=jnp.float32)

    # stacked per-modality weights, modality order (t, a, v)
    din_list = (HYP['orig_d_l'], HYP['orig_d_a'], HYP['orig_d_v'])
    w_in = jnp.stack([
        jnp.pad(w((din, d)), ((0, D_IN_PAD - din), (0, 0))) for din in din_list
    ])                                                           # [3, D_IN_PAD, d]

    params = {
        'w_in': w_in,
        'b_in': jnp.zeros((3, 1, d), jnp.float32),
        'wqkv': w((3, nl, d, 3 * d)),
        'bqkv': jnp.zeros((3, nl, 1, 3 * d), jnp.float32),
        'wo': w((3, nl, d, d)),
        'bo': jnp.zeros((3, nl, 1, d), jnp.float32),
        'w1': w((3, nl, d, dff)),
        'b1': jnp.zeros((3, nl, 1, dff), jnp.float32),
        'w2': w((3, nl, dff, d)),
        'b2': jnp.zeros((3, nl, 1, d), jnp.float32),
        # head (biases pre-shaped (1, n) so wrappers stay reshape-free)
        'p1_w': w((c, c)), 'p1_b': jnp.zeros((1, c), jnp.float32),
        'p2_w': w((c, c)), 'p2_b': jnp.zeros((1, c), jnp.float32),
        'out_w': w((c, nout)), 'out_b': jnp.zeros((1, nout), jnp.float32),
    }
    return params


# ------------------------------- forward pass --------------------------------
@jax.jit
def superformer_forward(params, t, a, v):
    def pad_feat(x):
        return jnp.pad(x, ((0, 0), (0, 0), (0, D_IN_PAD - x.shape[-1])))

    # stack modalities (t, a, v) and pre-flatten to [3, B*L, D_IN_PAD]
    xs = jnp.stack([pad_feat(t), pad_feat(a), pad_feat(v)], axis=0)
    xs = xs.reshape(N_MOD, t.shape[0] * t.shape[1], D_IN_PAD)
    return superformer_pallas(params, xs)          # single fused pallas_call


# ------------------------------------ main ------------------------------------
if __name__ == "__main__":
    key = jax.random.PRNGKey(0)
    kp, kt, ka, kv = jax.random.split(key, 4)
    params = init_params(kp)

    t = jax.random.normal(kt, (BATCH, SEQ, HYP['orig_d_l']), dtype=jnp.float32)
    a = jax.random.normal(ka, (BATCH, SEQ, HYP['orig_d_a']), dtype=jnp.float32)
    v = jax.random.normal(kv, (BATCH, SEQ, HYP['orig_d_v']), dtype=jnp.float32)

    out = superformer_forward(params, t, a, v)
    out = jax.block_until_ready(out)
    assert out.shape == (BATCH, HYP['output_dim'])
    print("KERNEL_OK")
</pallas_src>

<mosaic_0001>
module attributes {stable_mosaic.version = 11 : i64} {
  func.func @_superformer_kernel(%arg0: i32, %arg1: memref<1x16x32xf32, #tpu.memory_space<vmem>>, %arg2: memref<1x32x32xf32, #tpu.memory_space<vmem>>, %arg3: memref<1x1x32xf32, #tpu.memory_space<vmem>>, %arg4: memref<1x2x32x96xf32, #tpu.memory_space<vmem>>, %arg5: memref<1x2x1x96xf32, #tpu.memory_space<vmem>>, %arg6: memref<1x2x32x32xf32, #tpu.memory_space<vmem>>, %arg7: memref<1x2x1x32xf32, #tpu.memory_space<vmem>>, %arg8: memref<1x2x32x128xf32, #tpu.memory_space<vmem>>, %arg9: memref<1x2x1x128xf32, #tpu.memory_space<vmem>>, %arg10: memref<1x2x128x32xf32, #tpu.memory_space<vmem>>, %arg11: memref<1x2x1x32xf32, #tpu.memory_space<vmem>>, %arg12: memref<96x96xf32, #tpu.memory_space<vmem>>, %arg13: memref<1x96xf32, #tpu.memory_space<vmem>>, %arg14: memref<96x96xf32, #tpu.memory_space<vmem>>, %arg15: memref<1x96xf32, #tpu.memory_space<vmem>>, %arg16: memref<96x8xf32, #tpu.memory_space<vmem>>, %arg17: memref<1x8xf32, #tpu.memory_space<vmem>>, %arg18: memref<2x8xf32, #tpu.memory_space<vmem>>, %arg19: memref<3x2x32xf32, #tpu.memory_space<vmem>>) attributes {dimension_semantics = [#tpu.dimension_semantics<arbitrary>], iteration_bounds = array<i64: 3>, scalar_prefetch = 0 : i64, scratch_operands = 1 : i64, tpu.core_type = #tpu.core_type<tc>, window_params = [{transform_indices = @transform_0, window_bounds = array<i64: 1, 16, 32>}, {transform_indices = @transform_1, window_bounds = array<i64: 1, 32, 32>}, {transform_indices = @transform_2, window_bounds = array<i64: 1, 1, 32>}, {transform_indices = @transform_3, window_bounds = array<i64: 1, 2, 32, 96>}, {transform_indices = @transform_4, window_bounds = array<i64: 1, 2, 1, 96>}, {transform_indices = @transform_5, window_bounds = array<i64: 1, 2, 32, 32>}, {transform_indices = @transform_6, window_bounds = array<i64: 1, 2, 1, 32>}, {transform_indices = @transform_7, window_bounds = array<i64: 1, 2, 32, 128>}, {transform_indices = @transform_8, window_bounds = array<i64: 1, 2, 1, 128>}, {transform_indices = @transform_9, window_bounds = array<i64: 1, 2, 128, 32>}, {transform_indices = @transform_10, window_bounds = array<i64: 1, 2, 1, 32>}, {pipeline_mode = #tpu.pipeline_mode<synchronous>, transform_indices = @transform_11, window_bounds = array<i64: 96, 96>}, {pipeline_mode = #tpu.pipeline_mode<synchronous>, transform_indices = @transform_12, window_bounds = array<i64: 1, 96>}, {pipeline_mode = #tpu.pipeline_mode<synchronous>, transform_indices = @transform_13, window_bounds = array<i64: 96, 96>}, {pipeline_mode = #tpu.pipeline_mode<synchronous>, transform_indices = @transform_14, window_bounds = array<i64: 1, 96>}, {pipeline_mode = #tpu.pipeline_mode<synchronous>, transform_indices = @transform_15, window_bounds = array<i64: 96, 8>}, {pipeline_mode = #tpu.pipeline_mode<synchronous>, transform_indices = @transform_16, window_bounds = array<i64: 1, 8>}, {pipeline_mode = #tpu.pipeline_mode<synchronous>, transform_indices = @transform_17, window_bounds = array<i64: 2, 8>}]} {
    %c0 = arith.constant 0 : index
    %c0_0 = arith.constant 0 : index
    %c0_1 = arith.constant 0 : index
    %0 = vector.load %arg1[%c0, %c0_0, %c0_1] : memref<1x16x32xf32, #tpu.memory_space<vmem>>, vector<1x16x32xf32>
    %1 = vector.shape_cast %0 : vector<1x16x32xf32> to vector<16x32xf32>
    %c0_2 = arith.constant 0 : index
    %c0_3 = arith.constant 0 : index
    %c0_4 = arith.constant 0 : index
    %2 = vector.load %arg2[%c0_2, %c0_3, %c0_4] : memref<1x32x32xf32, #tpu.memory_space<vmem>>, vector<1x32x32xf32>
    %3 = vector.shape_cast %2 : vector<1x32x32xf32> to vector<32x32xf32>
    %cst = arith.constant dense<0.000000e+00> : vector<16x32xf32>
    %4 = tpu.matmul %1, %3, %cst {dimension_numbers = #tpu.dot_dimension_numbers<[1], [0], [0], [1], [0, 0, 1, 1], [], []>} : vector<16x32xf32>, vector<32x32xf32>, vector<16x32xf32> -> vector<16x32xf32>
    %c0_5 = arith.constant 0 : index
    %c0_6 = arith.constant 0 : index
    %c0_7 = arith.constant 0 : index
    %5 = vector.load %arg3[%c0_5, %c0_6, %c0_7] : memref<1x1x32xf32, #tpu.memory_space<vmem>>, vector<1x1x32xf32>
    %6 = vector.shape_cast %5 : vector<1x1x32xf32> to vector<1x32xf32>
    %7 = vector.broadcast %6 : vector<1x32xf32> to vector<16x32xf32>
    %8 = arith.addf %4, %7 : vector<16x32xf32>
    %c0_8 = arith.constant 0 : index
    %c0_9 = arith.constant 0 : index
    %c0_10 = arith.constant 0 : index
    %c0_11 = arith.constant 0 : index
    %9 = vector.load %arg4[%c0_8, %c0_9, %c0_10, %c0_11] : memref<1x2x32x96xf32, #tpu.memory_space<vmem>>, vector<1x1x32x96xf32>
    %10 = vector.shape_cast %9 : vector<1x1x32x96xf32> to vector<32x96xf32>
    %cst_12 = arith.constant dense<0.000000e+00> : vector<16x96xf32>
    %11 = tpu.matmul %8, %10, %cst_12 {dimension_numbers = #tpu.dot_dimension_numbers<[1], [0], [0], [1], [0, 0, 1, 1], [], []>} : vector<16x32xf32>, vector<32x96xf32>, vector<16x96xf32> -> vector<16x96xf32>
    %c0_13 = arith.constant 0 : index
    %c0_14 = arith.constant 0 : index
    %c0_15 = arith.constant 0 : index
    %c0_16 = arith.constant 0 : index
    %12 = vector.load %arg5[%c0_13, %c0_14, %c0_15, %c0_16] : memref<1x2x1x96xf32, #tpu.memory_space<vmem>>, vector<1x1x1x96xf32>
    %13 = vector.shape_cast %12 : vector<1x1x1x96xf32> to vector<1x96xf32>
    %14 = vector.broadcast %13 : vector<1x96xf32> to vector<16x96xf32>
    %15 = arith.addf %11, %14 : vector<16x96xf32>
    %16 = vector.shape_cast %15 : vector<16x96xf32> to vector<2x8x96xf32>
    %c0_17 = arith.constant 0 : index
    %c0_18 = arith.constant 0 : index
    %c0_19 = arith.constant 0 : index
    %c0_20 = arith.constant 0 : index
    %17 = vector.load %arg6[%c0_17, %c0_18, %c0_19, %c0_20] : memref<1x2x32x32xf32, #tpu.memory_space<vmem>>, vector<1x1x32x32xf32>
    %18 = vector.shape_cast %17 : vector<1x1x32x32xf32> to vector<32x32xf32>
    %c0_21 = arith.constant 0 : index
    %c0_22 = arith.constant 0 : index
    %c0_23 = arith.constant 0 : index
    %c0_24 = arith.constant 0 : index
    %19 = vector.load %arg7[%c0_21, %c0_22, %c0_23, %c0_24] : memref<1x2x1x32xf32, #tpu.memory_space<vmem>>, vector<1x1x1x32xf32>
    %20 = vector.shape_cast %19 : vector<1x1x1x32xf32> to vector<1x32xf32>
    %21 = vector.extract_strided_slice %16 {offsets = [0, 0, 0], sizes = [2, 8, 8], strides = [1, 1, 1]} : vector<2x8x96xf32> to vector<2x8x8xf32>
    %22 = vector.extract_strided_slice %16 {offsets = [0, 0, 32], sizes = [2, 8, 8], strides = [1, 1, 1]} : vector<2x8x96xf32> to vector<2x8x8xf32>
    %23 = vector.extract_strided_slice %16 {offsets = [0, 0, 64], sizes = [2, 8, 8], strides = [1, 1, 1]} : vector<2x8x96xf32> to vector<2x8x8xf32>
    "tpu.trace_start"() <{level = 10 : i32, message = "bqd,bkd->bqk"}> : () -> ()
    %cst_25 = arith.constant dense<0.000000e+00> : vector<2x8x8xf32>
    %24 = tpu.matmul %21, %22, %cst_25 {dimension_numbers = #tpu.dot_dimension_numbers<[2], [2], [1], [1], [0, 0, 0, 1, 1, 1], [0], [0]>} : vector<2x8x8xf32>, vector<2x8x8xf32>, vector<2x8x8xf32> -> vector<2x8x8xf32>
    "tpu.trace_stop"() : () -> ()
    %cst_26 = arith.constant 0.353553385 : f32
    %25 = vector.broadcast %cst_26 : f32 to vector<2x8x8xf32>
    %26 = arith.mulf %24, %25 : vector<2x8x8xf32>
    %cst_27 = arith.constant dense<0xFF800000> : vector<2x8xf32>
    %27 = vector.multi_reduction <maximumf>, %26, %cst_27 [2] : vector<2x8x8xf32> to vector<2x8xf32>
    %28 = vector.shape_cast %27 : vector<2x8xf32> to vector<2x8x1xf32>
    %29 = vector.broadcast %28 : vector<2x8x1xf32> to vector<2x8x8xf32>
    %30 = arith.subf %26, %29 : vector<2x8x8xf32>
    %31 = math.exp %30 : vector<2x8x8xf32>
    %cst_28 = arith.constant dense<0.000000e+00> : vector<2x8xf32>
    %32 = vector.multi_reduction <add>, %31, %cst_28 [2] : vector<2x8x8xf32> to vector<2x8xf32>
    %33 = vector.shape_cast %32 : vector<2x8xf32> to vector<2x8x1xf32>
    %34 = tpu.reciprocal %33 {approx = true} : vector<2x8x1xf32> -> vector<2x8x1xf32>
    %35 = vector.broadcast %34 : vector<2x8x1xf32> to vector<2x8x8xf32>
    %36 = arith.mulf %31, %35 : vector<2x8x8xf32>
    "tpu.trace_start"() <{level = 10 : i32, message = "bqk,bkd->bqd"}> : () -> ()
    %cst_29 = arith.constant dense<0.000000e+00> : vector<2x8x8xf32>
    %37 = tpu.matmul %36, %23, %cst_29 {dimension_numbers = #tpu.dot_dimension_numbers<[2], [1], [1], [2], [0, 0, 0, 1, 1, 2], [0], [0]>} : vector<2x8x8xf32>, vector<2x8x8xf32>, vector<2x8x8xf32> -> vector<2x8x8xf32>
    "tpu.trace_stop"() : () -> ()
    %38 = vector.shape_cast %37 : vector<2x8x8xf32> to vector<16x8xf32>
    %39 = vector.extract_strided_slice %18 {offsets = [0, 0], sizes = [8, 32], strides = [1, 1]} : vector<32x32xf32> to vector<8x32xf32>
    %cst_30 = arith.constant dense<0.000000e+00> : vector<16x32xf32>
    %40 = tpu.matmul %38, %39, %cst_30 {dimension_numbers = #tpu.dot_dimension_numbers<[1], [0], [0], [1], [0, 0, 1, 1], [], []>} : vector<16x8xf32>, vector<8x32xf32>, vector<16x32xf32> -> vector<16x32xf32>
    %41 = vector.broadcast %20 : vector<1x32xf32> to vector<16x32xf32>
    %42 = arith.addf %41, %40 : vector<16x32xf32>
    %43 = vector.extract_strided_slice %16 {offsets = [0, 0, 8], sizes = [2, 8, 8], strides = [1, 1, 1]} : vector<2x8x96xf32> to vector<2x8x8xf32>
    %44 = vector.extract_strided_slice %16 {offsets = [0, 0, 40], sizes = [2, 8, 8], strides = [1, 1, 1]} : vector<2x8x96xf32> to vector<2x8x8xf32>
    %45 = vector.extract_strided_slice %16 {offsets = [0, 0, 72], sizes = [2, 8, 8], strides = [1, 1, 1]} : vector<2x8x96xf32> to vector<2x8x8xf32>
    "tpu.trace_start"() <{level = 10 : i32, message = "bqd,bkd->bqk"}> : () -> ()
    %cst_31 = arith.constant dense<0.000000e+00> : vector<2x8x8xf32>
    %46 = tpu.matmul %43, %44, %cst_31 {dimension_numbers = #tpu.dot_dimension_numbers<[2], [2], [1], [1], [0, 0, 0, 1, 1, 1], [0], [0]>} : vector<2x8x8xf32>, vector<2x8x8xf32>, vector<2x8x8xf32> -> vector<2x8x8xf32>
    "tpu.trace_stop"() : () -> ()
    %cst_32 = arith.constant 0.353553385 : f32
    %47 = vector.broadcast %cst_32 : f32 to vector<2x8x8xf32>
    %48 = arith.mulf %46, %47 : vector<2x8x8xf32>
    %cst_33 = arith.constant dense<0xFF800000> : vector<2x8xf32>
    %49 = vector.multi_reduction <maximumf>, %48, %cst_33 [2] : vector<2x8x8xf32> to vector<2x8xf32>
    %50 = vector.shape_cast %49 : vector<2x8xf32> to vector<2x8x1xf32>
    %51 = vector.broadcast %50 : vector<2x8x1xf32> to vector<2x8x8xf32>
    %52 = arith.subf %48, %51 : vector<2x8x8xf32>
    %53 = math.exp %52 : vector<2x8x8xf32>
    %cst_34 = arith.constant dense<0.000000e+00> : vector<2x8xf32>
    %54 = vector.multi_reduction <add>, %53, %cst_34 [2] : vector<2x8x8xf32> to vector<2x8xf32>
    %55 = vector.shape_cast %54 : vector<2x8xf32> to vector<2x8x1xf32>
    %56 = tpu.reciprocal %55 {approx = true} : vector<2x8x1xf32> -> vector<2x8x1xf32>
    %57 = vector.broadcast %56 : vector<2x8x1xf32> to vector<2x8x8xf32>
    %58 = arith.mulf %53, %57 : vector<2x8x8xf32>
    "tpu.trace_start"() <{level = 10 : i32, message = "bqk,bkd->bqd"}> : () -> ()
    %cst_35 = arith.constant dense<0.000000e+00> : vector<2x8x8xf32>
    %59 = tpu.matmul %58, %45, %cst_35 {dimension_numbers = #tpu.dot_dimension_numbers<[2], [1], [1], [2], [0, 0, 0, 1, 1, 2], [0], [0]>} : vector<2x8x8xf32>, vector<2x8x8xf32>, vector<2x8x8xf32> -> vector<2x8x8xf32>
    "tpu.trace_stop"() : () -> ()
    %60 = vector.shape_cast %59 : vector<2x8x8xf32> to vector<16x8xf32>
    %61 = vector.extract_strided_slice %18 {offsets = [8, 0], sizes = [8, 32], strides = [1, 1]} : vector<32x32xf32> to vector<8x32xf32>
    %cst_36 = arith.constant dense<0.000000e+00> : vector<16x32xf32>
    %62 = tpu.matmul %60, %61, %cst_36 {dimension_numbers = #tpu.dot_dimension_numbers<[1], [0], [0], [1], [0, 0, 1, 1], [], []>} : vector<16x8xf32>, vector<8x32xf32>, vector<16x32xf32> -> vector<16x32xf32>
    %63 = arith.addf %42, %62 : vector<16x32xf32>
    %64 = vector.extract_strided_slice %16 {offsets = [0, 0, 16], sizes = [2, 8, 8], strides = [1, 1, 1]} : vector<2x8x96xf32> to vector<2x8x8xf32>
    %65 = vector.extract_strided_slice %16 {offsets = [0, 0, 48], sizes = [2, 8, 8], strides = [1, 1, 1]} : vector<2x8x96xf32> to vector<2x8x8xf32>
    %66 = vector.extract_strided_slice %16 {offsets = [0, 0, 80], sizes = [2, 8, 8], strides = [1, 1, 1]} : vector<2x8x96xf32> to vector<2x8x8xf32>
    "tpu.trace_start"() <{level = 10 : i32, message = "bqd,bkd->bqk"}> : () -> ()
    %cst_37 = arith.constant dense<0.000000e+00> : vector<2x8x8xf32>
    %67 = tpu.matmul %64, %65, %cst_37 {dimension_numbers = #tpu.dot_dimension_numbers<[2], [2], [1], [1], [0, 0, 0, 1, 1, 1], [0], [0]>} : vector<2x8x8xf32>, vector<2x8x8xf32>, vector<2x8x8xf32> -> vector<2x8x8xf32>
    "tpu.trace_stop"() : () -> ()
    %cst_38 = arith.constant 0.353553385 : f32
    %68 = vector.broadcast %cst_38 : f32 to vector<2x8x8xf32>
    %69 = arith.mulf %67, %68 : vector<2x8x8xf32>
    %cst_39 = arith.constant dense<0xFF800000> : vector<2x8xf32>
    %70 = vector.multi_reduction <maximumf>, %69, %cst_39 [2] : vector<2x8x8xf32> to vector<2x8xf32>
    %71 = vector.shape_cast %70 : vector<2x8xf32> to vector<2x8x1xf32>
    %72 = vector.broadcast %71 : vector<2x8x1xf32> to vector<2x8x8xf32>
    %73 = arith.subf %69, %72 : vector<2x8x8xf32>
    %74 = math.exp %73 : vector<2x8x8xf32>
    %cst_40 = arith.constant dense<0.000000e+00> : vector<2x8xf32>
    %75 = vector.multi_reduction <add>, %74, %cst_40 [2] : vector<2x8x8xf32> to vector<2x8xf32>
    %76 = vector.shape_cast %75 : vector<2x8xf32> to vector<2x8x1xf32>
    %77 = tpu.reciprocal %76 {approx = true} : vector<2x8x1xf32> -> vector<2x8x1xf32>
    %78 = vector.broadcast %77 : vector<2x8x1xf32> to vector<2x8x8xf32>
    %79 = arith.mulf %74, %78 : vector<2x8x8xf32>
    "tpu.trace_start"() <{level = 10 : i32, message = "bqk,bkd->bqd"}> : () -> ()
    %cst_41 = arith.constant dense<0.000000e+00> : vector<2x8x8xf32>
    %80 = tpu.matmul %79, %66, %cst_41 {dimension_numbers = #tpu.dot_dimension_numbers<[2], [1], [1], [2], [0, 0, 0, 1, 1, 2], [0], [0]>} : vector<2x8x8xf32>, vector<2x8x8xf32>, vector<2x8x8xf32> -> vector<2x8x8xf32>
    "tpu.trace_stop"() : () -> ()
    %81 = vector.shape_cast %80 : vector<2x8x8xf32> to vector<16x8xf32>
    %82 = vector.extract_strided_slice %18 {offsets = [16, 0], sizes = [8, 32], strides = [1, 1]} : vector<32x32xf32> to vector<8x32xf32>
    %cst_42 = arith.constant dense<0.000000e+00> : vector<16x32xf32>
    %83 = tpu.matmul %81, %82, %cst_42 {dimension_numbers = #tpu.dot_dimension_numbers<[1], [0], [0], [1], [0, 0, 1, 1], [], []>} : vector<16x8xf32>, vector<8x32xf32>, vector<16x32xf32> -> vector<16x32xf32>
    %84 = arith.addf %63, %83 : vector<16x32xf32>
    %85 = vector.extract_strided_slice %16 {offsets = [0, 0, 24], sizes = [2, 8, 8], strides = [1, 1, 1]} : vector<2x8x96xf32> to vector<2x8x8xf32>
    %86 = vector.extract_strided_slice %16 {offsets = [0, 0, 56], sizes = [2, 8, 8], strides = [1, 1, 1]} : vector<2x8x96xf32> to vector<2x8x8xf32>
    %87 = vector.extract_strided_slice %16 {offsets = [0, 0, 88], sizes = [2, 8, 8], strides = [1, 1, 1]} : vector<2x8x96xf32> to vector<2x8x8xf32>
    "tpu.trace_start"() <{level = 10 : i32, message = "bqd,bkd->bqk"}> : () -> ()
    %cst_43 = arith.constant dense<0.000000e+00> : vector<2x8x8xf32>
    %88 = tpu.matmul %85, %86, %cst_43 {dimension_numbers = #tpu.dot_dimension_numbers<[2], [2], [1], [1], [0, 0, 0, 1, 1, 1], [0], [0]>} : vector<2x8x8xf32>, vector<2x8x8xf32>, vector<2x8x8xf32> -> vector<2x8x8xf32>
    "tpu.trace_stop"() : () -> ()
    %cst_44 = arith.constant 0.353553385 : f32
    %89 = vector.broadcast %cst_44 : f32 to vector<2x8x8xf32>
    %90 = arith.mulf %88, %89 : vector<2x8x8xf32>
    %cst_45 = arith.constant dense<0xFF800000> : vector<2x8xf32>
    %91 = vector.multi_reduction <maximumf>, %90, %cst_45 [2] : vector<2x8x8xf32> to vector<2x8xf32>
    %92 = vector.shape_cast %91 : vector<2x8xf32> to vector<2x8x1xf32>
    %93 = vector.broadcast %92 : vector<2x8x1xf32> to vector<2x8x8xf32>
    %94 = arith.subf %90, %93 : vector<2x8x8xf32>
    %95 = math.exp %94 : vector<2x8x8xf32>
    %cst_46 = arith.constant dense<0.000000e+00> : vector<2x8xf32>
    %96 = vector.multi_reduction <add>, %95, %cst_46 [2] : vector<2x8x8xf32> to vector<2x8xf32>
    %97 = vector.shape_cast %96 : vector<2x8xf32> to vector<2x8x1xf32>
    %98 = tpu.reciprocal %97 {approx = true} : vector<2x8x1xf32> -> vector<2x8x1xf32>
    %99 = vector.broadcast %98 : vector<2x8x1xf32> to vector<2x8x8xf32>
    %100 = arith.mulf %95, %99 : vector<2x8x8xf32>
    "tpu.trace_start"() <{level = 10 : i32, message = "bqk,bkd->bqd"}> : () -> ()
    %cst_47 = arith.constant dense<0.000000e+00> : vector<2x8x8xf32>
    %101 = tpu.matmul %100, %87, %cst_47 {dimension_numbers = #tpu.dot_dimension_numbers<[2], [1], [1], [2], [0, 0, 0, 1, 1, 2], [0], [0]>} : vector<2x8x8xf32>, vector<2x8x8xf32>, vector<2x8x8xf32> -> vector<2x8x8xf32>
    "tpu.trace_stop"() : () -> ()
    %102 = vector.shape_cast %101 : vector<2x8x8xf32> to vector<16x8xf32>
    %103 = vector.extract_strided_slice %18 {offsets = [24, 0], sizes = [8, 32], strides = [1, 1]} : vector<32x32xf32> to vector<8x32xf32>
    %cst_48 = arith.constant dense<0.000000e+00> : vector<16x32xf32>
    %104 = tpu.matmul %102, %103, %cst_48 {dimension_numbers = #tpu.dot_dimension_numbers<[1], [0], [0], [1], [0, 0, 1, 1], [], []>} : vector<16x8xf32>, vector<8x32xf32>, vector<16x32xf32> -> vector<16x32xf32>
    %105 = arith.addf %84, %104 : vector<16x32xf32>
    %106 = arith.addf %8, %105 : vector<16x32xf32>
    %c0_49 = arith.constant 0 : index
    %c0_50 = arith.constant 0 : index
    %c0_51 = arith.constant 0 : index
    %c0_52 = arith.constant 0 : index
    %107 = vector.load %arg8[%c0_49, %c0_50, %c0_51, %c0_52] : memref<1x2x32x128xf32, #tpu.memory_space<vmem>>, vector<1x1x32x128xf32>
    %108 = vector.shape_cast %107 : vector<1x1x32x128xf32> to vector<32x128xf32>
    %cst_53 = arith.constant dense<0.000000e+00> : vector<16x128xf32>
    %109 = tpu.matmul %106, %108, %cst_53 {dimension_numbers = #tpu.dot_dimension_numbers<[1], [0], [0], [1], [0, 0, 1, 1], [], []>} : vector<16x32xf32>, vector<32x128xf32>, vector<16x128xf32> -> vector<16x128xf32>
    %c0_54 = arith.constant 0 : index
    %c0_55 = arith.constant 0 : index
    %c0_56 = arith.constant 0 : index
    %c0_57 = arith.constant 0 : index
    %110 = vector.load %arg9[%c0_54, %c0_55, %c0_56, %c0_57] : memref<1x2x1x128xf32, #tpu.memory_space<vmem>>, vector<1x1x1x128xf32>
    %111 = vector.shape_cast %110 : vector<1x1x1x128xf32> to vector<1x128xf32>
    %112 = vector.broadcast %111 : vector<1x128xf32> to vector<16x128xf32>
    %113 = arith.addf %109, %112 : vector<16x128xf32>
    %cst_58 = arith.constant 0.000000e+00 : f32
    %114 = vector.broadcast %cst_58 : f32 to vector<16x128xf32>
    %115 = arith.maximumf %113, %114 : vector<16x128xf32>
    %c0_59 = arith.constant 0 : index
    %c0_60 = arith.constant 0 : index
    %c0_61 = arith.constant 0 : index
    %c0_62 = arith.constant 0 : index
    %116 = vector.load %arg10[%c0_59, %c0_60, %c0_61, %c0_62] : memref<1x2x128x32xf32, #tpu.memory_space<vmem>>, vector<1x1x128x32xf32>
    %117 = vector.shape_cast %116 : vector<1x1x128x32xf32> to vector<128x32xf32>
    %cst_63 = arith.constant dense<0.000000e+00> : vector<16x32xf32>
    %118 = tpu.matmul %115, %117, %cst_63 {dimension_numbers = #tpu.dot_dimension_numbers<[1], [0], [0], [1], [0, 0, 1, 1], [], []>} : vector<16x128xf32>, vector<128x32xf32>, vector<16x32xf32> -> vector<16x32xf32>
    %c0_64 = arith.constant 0 : index
    %c0_65 = arith.constant 0 : index
    %c0_66 = arith.constant 0 : index
    %c0_67 = arith.constant 0 : index
    %119 = vector.load %arg11[%c0_64, %c0_65, %c0_66, %c0_67] : memref<1x2x1x32xf32, #tpu.memory_space<vmem>>, vector<1x1x1x32xf32>
    %120 = vector.shape_cast %119 : vector<1x1x1x32xf32> to vector<1x32xf32>
    %121 = vector.broadcast %120 : vector<1x32xf32> to vector<16x32xf32>
    %122 = arith.addf %118, %121 : vector<16x32xf32>
    %123 = arith.addf %106, %122 : vector<16x32xf32>
    %c0_68 = arith.constant 0 : index
    %c1 = arith.constant 1 : index
    %c0_69 = arith.constant 0 : index
    %c0_70 = arith.constant 0 : index
    %124 = vector.load %arg4[%c0_68, %c1, %c0_69, %c0_70] : memref<1x2x32x96xf32, #tpu.memory_space<vmem>>, vector<1x1x32x96xf32>
    %125 = vector.shape_cast %124 : vector<1x1x32x96xf32> to vector<32x96xf32>
    %cst_71 = arith.constant dense<0.000000e+00> : vector<16x96xf32>
    %126 = tpu.matmul %123, %125, %cst_71 {dimension_numbers = #tpu.dot_dimension_numbers<[1], [0], [0], [1], [0, 0, 1, 1], [], []>} : vector<16x32xf32>, vector<32x96xf32>, vector<16x96xf32> -> vector<16x96xf32>
    %c0_72 = arith.constant 0 : index
    %c1_73 = arith.constant 1 : index
    %c0_74 = arith.constant 0 : index
    %c0_75 = arith.constant 0 : index
    %127 = vector.load %arg5[%c0_72, %c1_73, %c0_74, %c0_75] : memref<1x2x1x96xf32, #tpu.memory_space<vmem>>, vector<1x1x1x96xf32>
    %128 = vector.shape_cast %127 : vector<1x1x1x96xf32> to vector<1x96xf32>
    %129 = vector.broadcast %128 : vector<1x96xf32> to vector<16x96xf32>
    %130 = arith.addf %126, %129 : vector<16x96xf32>
    %131 = vector.shape_cast %130 : vector<16x96xf32> to vector<2x8x96xf32>
    %c0_76 = arith.constant 0 : index
    %c1_77 = arith.constant 1 : index
    %c0_78 = arith.constant 0 : index
    %c0_79 = arith.constant 0 : index
    %132 = vector.load %arg6[%c0_76, %c1_77, %c0_78, %c0_79] : memref<1x2x32x32xf32, #tpu.memory_space<vmem>>, vector<1x1x32x32xf32>
    %133 = vector.shape_cast %132 : vector<1x1x32x32xf32> to vector<32x32xf32>
    %c0_80 = arith.constant 0 : index
    %c1_81 = arith.constant 1 : index
    %c0_82 = arith.constant 0 : index
    %c0_83 = arith.constant 0 : index
    %134 = vector.load %arg7[%c0_80, %c1_81, %c0_82, %c0_83] : memref<1x2x1x32xf32, #tpu.memory_space<vmem>>, vector<1x1x1x32xf32>
    %135 = vector.shape_cast %134 : vector<1x1x1x32xf32> to vector<1x32xf32>
    %136 = vector.extract_strided_slice %131 {offsets = [0, 0, 0], sizes = [2, 8, 8], strides = [1, 1, 1]} : vector<2x8x96xf32> to vector<2x8x8xf32>
    %137 = vector.extract_strided_slice %131 {offsets = [0, 0, 32], sizes = [2, 8, 8], strides = [1, 1, 1]} : vector<2x8x96xf32> to vector<2x8x8xf32>
    %138 = vector.extract_strided_slice %131 {offsets = [0, 0, 64], sizes = [2, 8, 8], strides = [1, 1, 1]} : vector<2x8x96xf32> to vector<2x8x8xf32>
    "tpu.trace_start"() <{level = 10 : i32, message = "bqd,bkd->bqk"}> : () -> ()
    %cst_84 = arith.constant dense<0.000000e+00> : vector<2x8x8xf32>
    %139 = tpu.matmul %136, %137, %cst_84 {dimension_numbers = #tpu.dot_dimension_numbers<[2], [2], [1], [1], [0, 0, 0, 1, 1, 1], [0], [0]>} : vector<2x8x8xf32>, vector<2x8x8xf32>, vector<2x8x8xf32> -> vector<2x8x8xf32>
    "tpu.trace_stop"() : () -> ()
    %cst_85 = arith.constant 0.353553385 : f32
    %140 = vector.broadcast %cst_85 : f32 to vector<2x8x8xf32>
    %141 = arith.mulf %139, %140 : vector<2x8x8xf32>
    %cst_86 = arith.constant dense<0xFF800000> : vector<2x8xf32>
    %142 = vector.multi_reduction <maximumf>, %141, %cst_86 [2] : vector<2x8x8xf32> to vector<2x8xf32>
    %143 = vector.shape_cast %142 : vector<2x8xf32> to vector<2x8x1xf32>
    %144 = vector.broadcast %143 : vector<2x8x1xf32> to vector<2x8x8xf32>
    %145 = arith.subf %141, %144 : vector<2x8x8xf32>
    %146 = math.exp %145 : vector<2x8x8xf32>
    %cst_87 = arith.constant dense<0.000000e+00> : vector<2x8xf32>
    %147 = vector.multi_reduction <add>, %146, %cst_87 [2] : vector<2x8x8xf32> to vector<2x8xf32>
    %148 = vector.shape_cast %147 : vector<2x8xf32> to vector<2x8x1xf32>
    %149 = tpu.reciprocal %148 {approx = true} : vector<2x8x1xf32> -> vector<2x8x1xf32>
    %150 = vector.broadcast %149 : vector<2x8x1xf32> to vector<2x8x8xf32>
    %151 = arith.mulf %146, %150 : vector<2x8x8xf32>
    "tpu.trace_start"() <{level = 10 : i32, message = "bqk,bkd->bqd"}> : () -> ()
    %cst_88 = arith.constant dense<0.000000e+00> : vector<2x8x8xf32>
    %152 = tpu.matmul %151, %138, %cst_88 {dimension_numbers = #tpu.dot_dimension_numbers<[2], [1], [1], [2], [0, 0, 0, 1, 1, 2], [0], [0]>} : vector<2x8x8xf32>, vector<2x8x8xf32>, vector<2x8x8xf32> -> vector<2x8x8xf32>
    "tpu.trace_stop"() : () -> ()
    %153 = vector.shape_cast %152 : vector<2x8x8xf32> to vector<16x8xf32>
    %154 = vector.extract_strided_slice %133 {offsets = [0, 0], sizes = [8, 32], strides = [1, 1]} : vector<32x32xf32> to vector<8x32xf32>
    %cst_89 = arith.constant dense<0.000000e+00> : vector<16x32xf32>
    %155 = tpu.matmul %153, %154, %cst_89 {dimension_numbers = #tpu.dot_dimension_numbers<[1], [0], [0], [1], [0, 0, 1, 1], [], []>} : vector<16x8xf32>, vector<8x32xf32>, vector<16x32xf32> -> vector<16x32xf32>
    %156 = vector.broadcast %135 : vector<1x32xf32> to vector<16x32xf32>
    %157 = arith.addf %156, %155 : vector<16x32xf32>
    %158 = vector.extract_strided_slice %131 {offsets = [0, 0, 8], sizes = [2, 8, 8], strides = [1, 1, 1]} : vector<2x8x96xf32> to vector<2x8x8xf32>
    %159 = vector.extract_strided_slice %131 {offsets = [0, 0, 40], sizes = [2, 8, 8], strides = [1, 1, 1]} : vector<2x8x96xf32> to vector<2x8x8xf32>
    %160 = vector.extract_strided_slice %131 {offsets = [0, 0, 72], sizes = [2, 8, 8], strides = [1, 1, 1]} : vector<2x8x96xf32> to vector<2x8x8xf32>
    "tpu.trace_start"() <{level = 10 : i32, message = "bqd,bkd->bqk"}> : () -> ()
    %cst_90 = arith.constant dense<0.000000e+00> : vector<2x8x8xf32>
    %161 = tpu.matmul %158, %159, %cst_90 {dimension_numbers = #tpu.dot_dimension_numbers<[2], [2], [1], [1], [0, 0, 0, 1, 1, 1], [0], [0]>} : vector<2x8x8xf32>, vector<2x8x8xf32>, vector<2x8x8xf32> -> vector<2x8x8xf32>
    "tpu.trace_stop"() : () -> ()
    %cst_91 = arith.constant 0.353553385 : f32
    %162 = vector.broadcast %cst_91 : f32 to vector<2x8x8xf32>
    %163 = arith.mulf %161, %162 : vector<2x8x8xf32>
    %cst_92 = arith.constant dense<0xFF800000> : vector<2x8xf32>
    %164 = vector.multi_reduction <maximumf>, %163, %cst_92 [2] : vector<2x8x8xf32> to vector<2x8xf32>
    %165 = vector.shape_cast %164 : vector<2x8xf32> to vector<2x8x1xf32>
    %166 = vector.broadcast %165 : vector<2x8x1xf32> to vector<2x8x8xf32>
    %167 = arith.subf %163, %166 : vector<2x8x8xf32>
    %168 = math.exp %167 : vector<2x8x8xf32>
    %cst_93 = arith.constant dense<0.000000e+00> : vector<2x8xf32>
    %169 = vector.multi_reduction <add>, %168, %cst_93 [2] : vector<2x8x8xf32> to vector<2x8xf32>
    %170 = vector.shape_cast %169 : vector<2x8xf32> to vector<2x8x1xf32>
    %171 = tpu.reciprocal %170 {approx = true} : vector<2x8x1xf32> -> vector<2x8x1xf32>
    %172 = vector.broadcast %171 : vector<2x8x1xf32> to vector<2x8x8xf32>
    %173 = arith.mulf %168, %172 : vector<2x8x8xf32>
    "tpu.trace_start"() <{level = 10 : i32, message = "bqk,bkd->bqd"}> : () -> ()
    %cst_94 = arith.constant dense<0.000000e+00> : vector<2x8x8xf32>
    %174 = tpu.matmul %173, %160, %cst_94 {dimension_numbers = #tpu.dot_dimension_numbers<[2], [1], [1], [2], [0, 0, 0, 1, 1, 2], [0], [0]>} : vector<2x8x8xf32>, vector<2x8x8xf32>, vector<2x8x8xf32> -> vector<2x8x8xf32>
    "tpu.trace_stop"() : () -> ()
    %175 = vector.shape_cast %174 : vector<2x8x8xf32> to vector<16x8xf32>
    %176 = vector.extract_strided_slice %133 {offsets = [8, 0], sizes = [8, 32], strides = [1, 1]} : vector<32x32xf32> to vector<8x32xf32>
    %cst_95 = arith.constant dense<0.000000e+00> : vector<16x32xf32>
    %177 = tpu.matmul %175, %176, %cst_95 {dimension_numbers = #tpu.dot_dimension_numbers<[1], [0], [0], [1], [0, 0, 1, 1], [], []>} : vector<16x8xf32>, vector<8x32xf32>, vector<16x32xf32> -> vector<16x32xf32>
    %178 = arith.addf %157, %177 : vector<16x32xf32>
    %179 = vector.extract_strided_slice %131 {offsets = [0, 0, 16], sizes = [2, 8, 8], strides = [1, 1, 1]} : vector<2x8x96xf32> to vector<2x8x8xf32>
    %180 = vector.extract_strided_slice %131 {offsets = [0, 0, 48], sizes = [2, 8, 8], strides = [1, 1, 1]} : vector<2x8x96xf32> to vector<2x8x8xf32>
    %181 = vector.extract_strided_slice %131 {offsets = [0, 0, 80], sizes = [2, 8, 8], strides = [1, 1, 1]} : vector<2x8x96xf32> to vector<2x8x8xf32>
    "tpu.trace_start"() <{level = 10 : i32, message = "bqd,bkd->bqk"}> : () -> ()
    %cst_96 = arith.constant dense<0.000000e+00> : vector<2x8x8xf32>
    %182 = tpu.matmul %179, %180, %cst_96 {dimension_numbers = #tpu.dot_dimension_numbers<[2], [2], [1], [1], [0, 0, 0, 1, 1, 1], [0], [0]>} : vector<2x8x8xf32>, vector<2x8x8xf32>, vector<2x8x8xf32> -> vector<2x8x8xf32>
    "tpu.trace_stop"() : () -> ()
    %cst_97 = arith.constant 0.353553385 : f32
    %183 = vector.broadcast %cst_97 : f32 to vector<2x8x8xf32>
    %184 = arith.mulf %182, %183 : vector<2x8x8xf32>
    %cst_98 = arith.constant dense<0xFF800000> : vector<2x8xf32>
    %185 = vector.multi_reduction <maximumf>, %184, %cst_98 [2] : vector<2x8x8xf32> to vector<2x8xf32>
    %186 = vector.shape_cast %185 : vector<2x8xf32> to vector<2x8x1xf32>
    %187 = vector.broadcast %186 : vector<2x8x1xf32> to vector<2x8x8xf32>
    %188 = arith.subf %184, %187 : vector<2x8x8xf32>
    %189 = math.exp %188 : vector<2x8x8xf32>
    %cst_99 = arith.constant dense<0.000000e+00> : vector<2x8xf32>
    %190 = vector.multi_reduction <add>, %189, %cst_99 [2] : vector<2x8x8xf32> to vector<2x8xf32>
    %191 = vector.shape_cast %190 : vector<2x8xf32> to vector<2x8x1xf32>
    %192 = tpu.reciprocal %191 {approx = true} : vector<2x8x1xf32> -> vector<2x8x1xf32>
    %193 = vector.broadcast %192 : vector<2x8x1xf32> to vector<2x8x8xf32>
    %194 = arith.mulf %189, %193 : vector<2x8x8xf32>
    "tpu.trace_start"() <{level = 10 : i32, message = "bqk,bkd->bqd"}> : () -> ()
    %cst_100 = arith.constant dense<0.000000e+00> : vector<2x8x8xf32>
    %195 = tpu.matmul %194, %181, %cst_100 {dimension_numbers = #tpu.dot_dimension_numbers<[2], [1], [1], [2], [0, 0, 0, 1, 1, 2], [0], [0]>} : vector<2x8x8xf32>, vector<2x8x8xf32>, vector<2x8x8xf32> -> vector<2x8x8xf32>
    "tpu.trace_stop"() : () -> ()
    %196 = vector.shape_cast %195 : vector<2x8x8xf32> to vector<16x8xf32>
    %197 = vector.extract_strided_slice %133 {offsets = [16, 0], sizes = [8, 32], strides = [1, 1]} : vector<32x32xf32> to vector<8x32xf32>
    %cst_101 = arith.constant dense<0.000000e+00> : vector<16x32xf32>
    %198 = tpu.matmul %196, %197, %cst_101 {dimension_numbers = #tpu.dot_dimension_numbers<[1], [0], [0], [1], [0, 0, 1, 1], [], []>} : vector<16x8xf32>, vector<8x32xf32>, vector<16x32xf32> -> vector<16x32xf32>
    %199 = arith.addf %178, %198 : vector<16x32xf32>
    %200 = vector.extract_strided_slice %131 {offsets = [0, 0, 24], sizes = [2, 8, 8], strides = [1, 1, 1]} : vector<2x8x96xf32> to vector<2x8x8xf32>
    %201 = vector.extract_strided_slice %131 {offsets = [0, 0, 56], sizes = [2, 8, 8], strides = [1, 1, 1]} : vector<2x8x96xf32> to vector<2x8x8xf32>
    %202 = vector.extract_strided_slice %131 {offsets = [0, 0, 88], sizes = [2, 8, 8], strides = [1, 1, 1]} : vector<2x8x96xf32> to vector<2x8x8xf32>
    "tpu.trace_start"() <{level = 10 : i32, message = "bqd,bkd->bqk"}> : () -> ()
    %cst_102 = arith.constant dense<0.000000e+00> : vector<2x8x8xf32>
    %203 = tpu.matmul %200, %201, %cst_102 {dimension_numbers = #tpu.dot_dimension_numbers<[2], [2], [1], [1], [0, 0, 0, 1, 1, 1], [0], [0]>} : vector<2x8x8xf32>, vector<2x8x8xf32>, vector<2x8x8xf32> -> vector<2x8x8xf32>
    "tpu.trace_stop"() : () -> ()
    %cst_103 = arith.constant 0.353553385 : f32
    %204 = vector.broadcast %cst_103 : f32 to vector<2x8x8xf32>
    %205 = arith.mulf %203, %204 : vector<2x8x8xf32>
    %cst_104 = arith.constant dense<0xFF800000> : vector<2x8xf32>
    %206 = vector.multi_reduction <maximumf>, %205, %cst_104 [2] : vector<2x8x8xf32> to vector<2x8xf32>
    %207 = vector.shape_cast %206 : vector<2x8xf32> to vector<2x8x1xf32>
    %208 = vector.broadcast %207 : vector<2x8x1xf32> to vector<2x8x8xf32>
    %209 = arith.subf %205, %208 : vector<2x8x8xf32>
    %210 = math.exp %209 : vector<2x8x8xf32>
    %cst_105 = arith.constant dense<0.000000e+00> : vector<2x8xf32>
    %211 = vector.multi_reduction <add>, %210, %cst_105 [2] : vector<2x8x8xf32> to vector<2x8xf32>
    %212 = vector.shape_cast %211 : vector<2x8xf32> to vector<2x8x1xf32>
    %213 = tpu.reciprocal %212 {approx = true} : vector<2x8x1xf32> -> vector<2x8x1xf32>
    %214 = vector.broadcast %213 : vector<2x8x1xf32> to vector<2x8x8xf32>
    %215 = arith.mulf %210, %214 : vector<2x8x8xf32>
    "tpu.trace_start"() <{level = 10 : i32, message = "bqk,bkd->bqd"}> : () -> ()
    %cst_106 = arith.constant dense<0.000000e+00> : vector<2x8x8xf32>
    %216 = tpu.matmul %215, %202, %cst_106 {dimension_numbers = #tpu.dot_dimension_numbers<[2], [1], [1], [2], [0, 0, 0, 1, 1, 2], [0], [0]>} : vector<2x8x8xf32>, vector<2x8x8xf32>, vector<2x8x8xf32> -> vector<2x8x8xf32>
    "tpu.trace_stop"() : () -> ()
    %217 = vector.shape_cast %216 : vector<2x8x8xf32> to vector<16x8xf32>
    %218 = vector.extract_strided_slice %133 {offsets = [24, 0], sizes = [8, 32], strides = [1, 1]} : vector<32x32xf32> to vector<8x32xf32>
    %cst_107 = arith.constant dense<0.000000e+00> : vector<16x32xf32>
    %219 = tpu.matmul %217, %218, %cst_107 {dimension_numbers = #tpu.dot_dimension_numbers<[1], [0], [0], [1], [0, 0, 1, 1], [], []>} : vector<16x8xf32>, vector<8x32xf32>, vector<16x32xf32> -> vector<16x32xf32>
    %220 = arith.addf %199, %219 : vector<16x32xf32>
    %221 = arith.addf %123, %220 : vector<16x32xf32>
    %c0_108 = arith.constant 0 : index
    %c1_109 = arith.constant 1 : index
    %c0_110 = arith.constant 0 : index
    %c0_111 = arith.constant 0 : index
    %222 = vector.load %arg8[%c0_108, %c1_109, %c0_110, %c0_111] : memref<1x2x32x128xf32, #tpu.memory_space<vmem>>, vector<1x1x32x128xf32>
    %223 = vector.shape_cast %222 : vector<1x1x32x128xf32> to vector<32x128xf32>
    %cst_112 = arith.constant dense<0.000000e+00> : vector<16x128xf32>
    %224 = tpu.matmul %221, %223, %cst_112 {dimension_numbers = #tpu.dot_dimension_numbers<[1], [0], [0], [1], [0, 0, 1, 1], [], []>} : vector<16x32xf32>, vector<32x128xf32>, vector<16x128xf32> -> vector<16x128xf32>
    %c0_113 = arith.constant 0 : index
    %c1_114 = arith.constant 1 : index
    %c0_115 = arith.constant 0 : index
    %c0_116 = arith.constant 0 : index
    %225 = vector.load %arg9[%c0_113, %c1_114, %c0_115, %c0_116] : memref<1x2x1x128xf32, #tpu.memory_space<vmem>>, vector<1x1x1x128xf32>
    %226 = vector.shape_cast %225 : vector<1x1x1x128xf32> to vector<1x128xf32>
    %227 = vector.broadcast %226 : vector<1x128xf32> to vector<16x128xf32>
    %228 = arith.addf %224, %227 : vector<16x128xf32>
    %cst_117 = arith.constant 0.000000e+00 : f32
    %229 = vector.broadcast %cst_117 : f32 to vector<16x128xf32>
    %230 = arith.maximumf %228, %229 : vector<16x128xf32>
    %c0_118 = arith.constant 0 : index
    %c1_119 = arith.constant 1 : index
    %c0_120 = arith.constant 0 : index
    %c0_121 = arith.constant 0 : index
    %231 = vector.load %arg10[%c0_118, %c1_119, %c0_120, %c0_121] : memref<1x2x128x32xf32, #tpu.memory_space<vmem>>, vector<1x1x128x32xf32>
    %232 = vector.shape_cast %231 : vector<1x1x128x32xf32> to vector<128x32xf32>
    %cst_122 = arith.constant dense<0.000000e+00> : vector<16x32xf32>
    %233 = tpu.matmul %230, %232, %cst_122 {dimension_numbers = #tpu.dot_dimension_numbers<[1], [0], [0], [1], [0, 0, 1, 1], [], []>} : vector<16x128xf32>, vector<128x32xf32>, vector<16x32xf32> -> vector<16x32xf32>
    %c0_123 = arith.constant 0 : index
    %c1_124 = arith.constant 1 : index
    %c0_125 = arith.constant 0 : index
    %c0_126 = arith.constant 0 : index
    %234 = vector.load %arg11[%c0_123, %c1_124, %c0_125, %c0_126] : memref<1x2x1x32xf32, #tpu.memory_space<vmem>>, vector<1x1x1x32xf32>
    %235 = vector.shape_cast %234 : vector<1x1x1x32xf32> to vector<1x32xf32>
    %236 = vector.broadcast %235 : vector<1x32xf32> to vector<16x32xf32>
    %237 = arith.addf %233, %236 : vector<16x32xf32>
    %238 = arith.addf %221, %237 : vector<16x32xf32>
    %239 = vector.shape_cast %238 : vector<16x32xf32> to vector<2x8x32xf32>
    %240 = vector.extract_strided_slice %239 {offsets = [0, 7, 0], sizes = [2, 1, 32], strides = [1, 1, 1]} : vector<2x8x32xf32> to vector<2x1x32xf32>
    %241 = vector.shape_cast %240 : vector<2x1x32xf32> to vector<2x32xf32>
    %c0_i32 = arith.constant 0 : i32
    %242 = arith.cmpi eq, %arg0, %c0_i32 : i32
    %243 = arith.extui %242 : i1 to i32
    %c0_i32_127 = arith.constant 0 : i32
    %244 = arith.cmpi ne, %243, %c0_i32_127 : i32
    scf.if %244 {
      %c0_132 = arith.constant 0 : index
      %c0_133 = arith.constant 0 : index
      %c0_134 = arith.constant 0 : index
      %254 = vector.load %arg19[%c0_132, %c0_133, %c0_134] : memref<3x2x32xf32, #tpu.memory_space<vmem>>, vector<1x2x32xf32>
      %255 = vector.shape_cast %254 : vector<1x2x32xf32> to vector<2x32xf32>
      %256 = vector.shape_cast %241 : vector<2x32xf32> to vector<1x2x32xf32>
      tpu.vector_store %arg19[%c0_132, %c0_133, %c0_134], %256 {strides = array<i32>} : memref<3x2x32xf32, #tpu.memory_space<vmem>>, vector<1x2x32xf32>,
    } else {
    }
    %c1_i32 = arith.constant 1 : i32
    %245 = arith.cmpi eq, %arg0, %c1_i32 : i32
    %246 = arith.extui %245 : i1 to i32
    %c0_i32_128 = arith.constant 0 : i32
    %247 = arith.cmpi ne, %246, %c0_i32_128 : i32
    scf.if %247 {
      %c1_132 = arith.constant 1 : index
      %c0_133 = arith.constant 0 : index
      %c0_134 = arith.constant 0 : index
      %254 = vector.load %arg19[%c1_132, %c0_133, %c0_134] : memref<3x2x32xf32, #tpu.memory_space<vmem>>, vector<1x2x32xf32>
      %255 = vector.shape_cast %254 : vector<1x2x32xf32> to vector<2x32xf32>
      %256 = vector.shape_cast %241 : vector<2x32xf32> to vector<1x2x32xf32>
      tpu.vector_store %arg19[%c1_132, %c0_133, %c0_134], %256 {strides = array<i32>} : memref<3x2x32xf32, #tpu.memory_space<vmem>>, vector<1x2x32xf32>,
    } else {
    }
    %c2_i32 = arith.constant 2 : i32
    %248 = arith.cmpi eq, %arg0, %c2_i32 : i32
    %249 = arith.extui %248 : i1 to i32
    %c0_i32_129 = arith.constant 0 : i32
    %250 = arith.cmpi ne, %249, %c0_i32_129 : i32
    scf.if %250 {
      %c2 = arith.constant 2 : index
      %c0_132 = arith.constant 0 : index
      %c0_133 = arith.constant 0 : index
      %254 = vector.load %arg19[%c2, %c0_132, %c0_133] : memref<3x2x32xf32, #tpu.memory_space<vmem>>, vector<1x2x32xf32>
      %255 = vector.shape_cast %254 : vector<1x2x32xf32> to vector<2x32xf32>
      %256 = vector.shape_cast %241 : vector<2x32xf32> to vector<1x2x32xf32>
      tpu.vector_store %arg19[%c2, %c0_132, %c0_133], %256 {strides = array<i32>} : memref<3x2x32xf32, #tpu.memory_space<vmem>>, vector<1x2x32xf32>,
    } else {
    }
    %c2_i32_130 = arith.constant 2 : i32
    %251 = arith.cmpi eq, %arg0, %c2_i32_130 : i32
    %252 = arith.extui %251 : i1 to i32
    %c0_i32_131 = arith.constant 0 : i32
    %253 = arith.cmpi ne, %252, %c0_i32_131 : i32
    scf.if %253 {
      %c0_132 = arith.constant 0 : index
      %c0_133 = arith.constant 0 : index
      %c0_134 = arith.constant 0 : index
      %254 = vector.load %arg19[%c0_132, %c0_133, %c0_134] : memref<3x2x32xf32, #tpu.memory_space<vmem>>, vector<1x2x32xf32>
      %255 = vector.shape_cast %254 : vector<1x2x32xf32> to vector<2x32xf32>
      %c1_135 = arith.constant 1 : index
      %c0_136 = arith.constant 0 : index
      %c0_137 = arith.constant 0 : index
      %256 = vector.load %arg19[%c1_135, %c0_136, %c0_137] : memref<3x2x32xf32, #tpu.memory_space<vmem>>, vector<1x2x32xf32>
      %257 = vector.shape_cast %256 : vector<1x2x32xf32> to vector<2x32xf32>
      %c2 = arith.constant 2 : index
      %c0_138 = arith.constant 0 : index
      %c0_139 = arith.constant 0 : index
      %258 = vector.load %arg19[%c2, %c0_138, %c0_139] : memref<3x2x32xf32, #tpu.memory_space<vmem>>, vector<1x2x32xf32>
      %259 = vector.shape_cast %258 : vector<1x2x32xf32> to vector<2x32xf32>
      %260 = tpu.concatenate %255, %257, %259 in 1 : vector<2x32xf32>, vector<2x32xf32>, vector<2x32xf32> -> vector<2x96xf32>
      %c0_140 = arith.constant 0 : index
      %c0_141 = arith.constant 0 : index
      %261 = vector.load %arg12[%c0_140, %c0_141] : memref<96x96xf32, #tpu.memory_space<vmem>>, vector<96x96xf32>
      %cst_142 = arith.constant dense<0.000000e+00> : vector<2x96xf32>
      %262 = tpu.matmul %260, %261, %cst_142 {dimension_numbers = #tpu.dot_dimension_numbers<[1], [0], [0], [1], [0, 0, 1, 1], [], []>} : vector<2x96xf32>, vector<96x96xf32>, vector<2x96xf32> -> vector<2x96xf32>
      %c0_143 = arith.constant 0 : index
      %c0_144 = arith.constant 0 : index
      %263 = vector.load %arg13[%c0_143, %c0_144] : memref<1x96xf32, #tpu.memory_space<vmem>>, vector<1x96xf32>
      %264 = vector.broadcast %263 : vector<1x96xf32> to vector<2x96xf32>
      %265 = arith.addf %262, %264 : vector<2x96xf32>
      %cst_145 = arith.constant 0.000000e+00 : f32
      %266 = vector.broadcast %cst_145 : f32 to vector<2x96xf32>
      %267 = arith.maximumf %265, %266 : vector<2x96xf32>
      %c0_146 = arith.constant 0 : index
      %c0_147 = arith.constant 0 : index
      %268 = vector.load %arg14[%c0_146, %c0_147] : memref<96x96xf32, #tpu.memory_space<vmem>>, vector<96x96xf32>
      %cst_148 = arith.constant dense<0.000000e+00> : vector<2x96xf32>
      %269 = tpu.matmul %267, %268, %cst_148 {dimension_numbers = #tpu.dot_dimension_numbers<[1], [0], [0], [1], [0, 0, 1, 1], [], []>} : vector<2x96xf32>, vector<96x96xf32>, vector<2x96xf32> -> vector<2x96xf32>
      %c0_149 = arith.constant 0 : index
      %c0_150 = arith.constant 0 : index
      %270 = vector.load %arg15[%c0_149, %c0_150] : memref<1x96xf32, #tpu.memory_space<vmem>>, vector<1x96xf32>
      %271 = vector.broadcast %270 : vector<1x96xf32> to vector<2x96xf32>
      %272 = arith.addf %269, %271 : vector<2x96xf32>
      %273 = arith.addf %272, %260 : vector<2x96xf32>
      %c0_151 = arith.constant 0 : index
      %c0_152 = arith.constant 0 : index
      %274 = vector.load %arg16[%c0_151, %c0_152] : memref<96x8xf32, #tpu.memory_space<vmem>>, vector<96x8xf32>
      %cst_153 = arith.constant dense<0.000000e+00> : vector<2x8xf32>
      %275 = tpu.matmul %273, %274, %cst_153 {dimension_numbers = #tpu.dot_dimension_numbers<[1], [0], [0], [1], [0, 0, 1, 1], [], []>} : vector<2x96xf32>, vector<96x8xf32>, vector<2x8xf32> -> vector<2x8xf32>
      %c0_154 = arith.constant 0 : index
      %c0_155 = arith.constant 0 : index
      %276 = vector.load %arg17[%c0_154, %c0_155] : memref<1x8xf32, #tpu.memory_space<vmem>>, vector<1x8xf32>
      %277 = vector.broadcast %276 : vector<1x8xf32> to vector<2x8xf32>
      %278 = arith.addf %275, %277 : vector<2x8xf32>
      %c0_156 = arith.constant 0 : index
      %c0_157 = arith.constant 0 : index
      %279 = vector.load %arg18[%c0_156, %c0_157] : memref<2x8xf32, #tpu.memory_space<vmem>>, vector<2x8xf32>
      tpu.vector_store %arg18[%c0_156, %c0_157], %278 {strides = array<i32>} : memref<2x8xf32, #tpu.memory_space<vmem>>, vector<2x8xf32>,
    } else {
    }
    return
  }
  func.func @transform_0(%arg0: i32) -> (i32, i32, i32) {
    %c0_i32 = arith.constant 0 : i32
    %c0_i32_0 = arith.constant 0 : i32
    %c0_i32_1 = arith.constant 0 : i32
    return %arg0, %c0_i32, %c0_i32_0 : i32, i32, i32
  }
  func.func @transform_1(%arg0: i32) -> (i32, i32, i32) {
    %c0_i32 = arith.constant 0 : i32
    %c0_i32_0 = arith.constant 0 : i32
    %c0_i32_1 = arith.constant 0 : i32
    return %arg0, %c0_i32, %c0_i32_0 : i32, i32, i32
  }
  func.func @transform_2(%arg0: i32) -> (i32, i32, i32) {
    %c0_i32 = arith.constant 0 : i32
    %c0_i32_0 = arith.constant 0 : i32
    %c0_i32_1 = arith.constant 0 : i32
    return %arg0, %c0_i32, %c0_i32_0 : i32, i32, i32
  }
  func.func @transform_3(%arg0: i32) -> (i32, i32, i32, i32) {
    %c0_i32 = arith.constant 0 : i32
    %c0_i32_0 = arith.constant 0 : i32
    %c0_i32_1 = arith.constant 0 : i32
    %c0_i32_2 = arith.constant 0 : i32
    return %arg0, %c0_i32, %c0_i32_0, %c0_i32_1 : i32, i32, i32, i32
  }
  func.func @transform_4(%arg0: i32) -> (i32, i32, i32, i32) {
    %c0_i32 = arith.constant 0 : i32
    %c0_i32_0 = arith.constant 0 : i32
    %c0_i32_1 = arith.constant 0 : i32
    %c0_i32_2 = arith.constant 0 : i32
    return %arg0, %c0_i32, %c0_i32_0, %c0_i32_1 : i32, i32, i32, i32
  }
  func.func @transform_5(%arg0: i32) -> (i32, i32, i32, i32) {
    %c0_i32 = arith.constant 0 : i32
    %c0_i32_0 = arith.constant 0 : i32
    %c0_i32_1 = arith.constant 0 : i32
    %c0_i32_2 = arith.constant 0 : i32
    return %arg0, %c0_i32, %c0_i32_0, %c0_i32_1 : i32, i32, i32, i32
  }
  func.func @transform_6(%arg0: i32) -> (i32, i32, i32, i32) {
    %c0_i32 = arith.constant 0 : i32
    %c0_i32_0 = arith.constant 0 : i32
    %c0_i32_1 = arith.constant 0 : i32
    %c0_i32_2 = arith.constant 0 : i32
    return %arg0, %c0_i32, %c0_i32_0, %c0_i32_1 : i32, i32, i32, i32
  }
  func.func @transform_7(%arg0: i32) -> (i32, i32, i32, i32) {
    %c0_i32 = arith.constant 0 : i32
    %c0_i32_0 = arith.constant 0 : i32
    %c0_i32_1 = arith.constant 0 : i32
    %c0_i32_2 = arith.constant 0 : i32
    return %arg0, %c0_i32, %c0_i32_0, %c0_i32_1 : i32, i32, i32, i32
  }
  func.func @transform_8(%arg0: i32) -> (i32, i32, i32, i32) {
    %c0_i32 = arith.constant 0 : i32
    %c0_i32_0 = arith.constant 0 : i32
    %c0_i32_1 = arith.constant 0 : i32
    %c0_i32_2 = arith.constant 0 : i32
    return %arg0, %c0_i32, %c0_i32_0, %c0_i32_1 : i32, i32, i32, i32
  }
  func.func @transform_9(%arg0: i32) -> (i32, i32, i32, i32) {
    %c0_i32 = arith.constant 0 : i32
    %c0_i32_0 = arith.constant 0 : i32
    %c0_i32_1 = arith.constant 0 : i32
    %c0_i32_2 = arith.constant 0 : i32
    return %arg0, %c0_i32, %c0_i32_0, %c0_i32_1 : i32, i32, i32, i32
  }
  func.func @transform_10(%arg0: i32) -> (i32, i32, i32, i32) {
    %c0_i32 = arith.constant 0 : i32
    %c0_i32_0 = arith.constant 0 : i32
    %c0_i32_1 = arith.constant 0 : i32
    %c0_i32_2 = arith.constant 0 : i32
    return %arg0, %c0_i32, %c0_i32_0, %c0_i32_1 : i32, i32, i32, i32
  }
  func.func @transform_11(%arg0: i32) -> (i32, i32) {
    %c0_i32 = arith.constant 0 : i32
    %c0_i32_0 = arith.constant 0 : i32
    %c0_i32_1 = arith.constant 0 : i32
    return %c0_i32, %c0_i32_0 : i32, i32
  }
  func.func @transform_12(%arg0: i32) -> (i32, i32) {
    %c0_i32 = arith.constant 0 : i32
    %c0_i32_0 = arith.constant 0 : i32
    %c0_i32_1 = arith.constant 0 : i32
    return %c0_i32, %c0_i32_0 : i32, i32
  }
  func.func @transform_13(%arg0: i32) -> (i32, i32) {
    %c0_i32 = arith.constant 0 : i32
    %c0_i32_0 = arith.constant 0 : i32
    %c0_i32_1 = arith.constant 0 : i32
    return %c0_i32, %c0_i32_0 : i32, i32
  }
  func.func @transform_14(%arg0: i32) -> (i32, i32) {
    %c0_i32 = arith.constant 0 : i32
    %c0_i32_0 = arith.constant 0 : i32
    %c0_i32_1 = arith.constant 0 : i32
    return %c0_i32, %c0_i32_0 : i32, i32
  }
  func.func @transform_15(%arg0: i32) -> (i32, i32) {
    %c0_i32 = arith.constant 0 : i32
    %c0_i32_0 = arith.constant 0 : i32
    %c0_i32_1 = arith.constant 0 : i32
    return %c0_i32, %c0_i32_0 : i32, i32
  }
  func.func @transform_16(%arg0: i32) -> (i32, i32) {
    %c0_i32 = arith.constant 0 : i32
    %c0_i32_0 = arith.constant 0 : i32
    %c0_i32_1 = arith.constant 0 : i32
    return %c0_i32, %c0_i32_0 : i32, i32
  }
  func.func @transform_17(%arg0: i32) -> (i32, i32) {
    %c0_i32 = arith.constant 0 : i32
    %c0_i32_0 = arith.constant 0 : i32
    %c0_i32_1 = arith.constant 0 : i32
    return %c0_i32, %c0_i32_0 : i32, i32
  }
}

</mosaic_0001>

<bundles_post_ra>
// kernel: superformer_forward.1
= control target key start
LH: loop header
LB: loop body
LE: loop exit
PB: predicated region body
PF: predicated region fallthrough
CT: control target
= control target key end

     0   :  { %s6907_s0 = inlined_call_operand.vmem [shape: f32[3,16,32], index: 0, kind: input, shape index: {}]   ;;  %s6908_s1 = inlined_call_operand.vmem [shape: f32[3,32,32], index: 1, kind: input, shape index: {}]   ;;  %s6909_s2 = inlined_call_operand.vmem [shape: f32[3,1,32], index: 2, kind: input, shape index: {}]   ;;  %s6910_s3 = inlined_call_operand.vmem [shape: f32[3,2,32,96], index: 3, kind: input, shape index: {}]   ;;  %s6911_s4 = inlined_call_operand.vmem [shape: f32[3,2,1,96], index: 4, kind: input, shape index: {}]   ;;  %s6912_s5 = inlined_call_operand.vmem [shape: f32[3,2,32,32], index: 5, kind: input, shape index: {}]   ;;  %s6913_s6 = inlined_call_operand.vmem [shape: f32[3,2,1,32], index: 6, kind: input, shape index: {}]   ;;  %s6914_s7 = inlined_call_operand.vmem [shape: f32[3,2,32,128], index: 7, kind: input, shape index: {}]   ;;  %s6915_s8 = inlined_call_operand.vmem [shape: f32[3,2,1,128], index: 8, kind: input, shape index: {}]   ;;  %s6916_s9 = inlined_call_operand.vmem [shape: f32[3,2,128,32], index: 9, kind: input, shape index: {}]   ;;  %s6917_s10 = inlined_call_operand.vmem [shape: f32[3,2,1,32], index: 10, kind: input, shape index: {}]   ;;  %s6918_s11 = inlined_call_operand.vmem [shape: f32[96,96], index: 11, kind: input, shape index: {}]   ;;  %s6919_s12 = inlined_call_operand.vmem [shape: f32[1,96], index: 12, kind: input, shape index: {}]   ;;  %s6920_s13 = inlined_call_operand.vmem [shape: f32[96,96], index: 13, kind: input, shape index: {}]   ;;  %s6921_s14 = inlined_call_operand.vmem [shape: f32[1,96], index: 14, kind: input, shape index: {}]   ;;  %s6922_s15 = inlined_call_operand.vmem [shape: f32[96,8], index: 15, kind: input, shape index: {}]   ;;  %s6923_s16 = inlined_call_operand.vmem [shape: f32[1,8], index: 16, kind: input, shape index: {}]   ;;  %s6924_s17 = inlined_call_operand.hbm [shape: f32[2,8], index: 17, kind: output, shape index: {}]  }
   0x1   :  { %6947 = sst [smem:[#allocation6_spill]] %s6907_s0 }
   0x2   :  { %6948 = sst [smem:[#allocation7_spill]] %s6908_s1 }
   0x3   :  { %6949 = sst [smem:[#allocation8_spill]] %s6909_s2 }
   0x4   :  { %22 = vsyncpa [#allocation4], 0  ;;  %s6228_s24 = smov 0  }
   0x5 LB: > { %s6234_s25 = sadd.s32 4294967295, %s6118_s24   ;;  %p5238_p0 = scmp.ge.s32.totalorder %s6118_s24, 1  ;;  %s6118_s24 = sphi %s6228_s24, %s28_s24  }
   0x6   : > { %p577_p1 = scmp.lt.s32.totalorder %s6118_s24, 4 }
   0x8   : > { %p578_p2 = pnand %p5238_p0, %p577_p1 }
   0x9   : > { %p668_p3 = scmp.lt.s32.totalorder (!%p578_p2), %s6234_s25, 2  ;;  %s6950_s0 = sld [smem:[#allocation7_spill]] (!%p578_p2) }
   0xa   : > { %581 = sbr.rel (%p578_p2) target bundleno = 8437 (0x20f5), region = 88  ;;  %s6951_s21 = sld [smem:[#allocation6_spill]] (!%p578_p2) }
   0xb   : > { %s6952_s2 = sld [smem:[#allocation8_spill]] (!%p578_p2)  ;;  %s6943_s23 = smov (!%p578_p2), 64  }
   0xc   : > { %s6941_s29 = smov (!%p578_p2), 88   ;;  %s6929_s20 = smov (!%p578_p2), 56  }
   0xd   : > { %p5370_p4 = scmp.ne.s32.totalorder (!%p578_p2), %s6234_s25, 0 }
   0xf   : > { %s6240_s26 = scalar_select %p668_p3, %s6234_s25, 2  ;;  %vm730_vm0 = vcmask 261120   ;;  %v6120_v15 = vmov 0.0   ;;  %vm6121_vm1 = vmmov 0   ;;  %vm912_vm2 = vcmask 64512  }
  0x10   : > { %5619 = vmatprep.subr.mxu1 %v6120_v15  ;;  %5621 = vmatprep.mubr.msk.f32.mxu1 %vm6121_vm1, %v6120_v15 }
  0x11   : > { %s5384_s27 = sshll.u32 %s6240_s26, 5  ;;  %s5383_s18 = sshll.u32 %s6240_s26, 4 }
  0x12   : > { %s677_s30 = scalar_lea.vmem %s6950_s0, %s5384_s27  ;;  %s6248_s19 = sshll.u32 %s6240_s26, 6 }
  0x13   : > { %v722_v0 = vld [vmem:[%s677_s30 + $0x18] sm:$0xff]  ;;  %v721_v1 = vld [vmem:[%s677_s30 + $0x10] sm:$0xff]  ;;  %s672_s22 = scalar_lea.vmem %s6951_s21, %s5383_s18  ;;  %v720_v2 = vld [vmem:[%s677_s30 + $0x8] sm:$0xff]  ;;  %s6258_s28 = scalar_lea.vmem %s6910_s3, %s6248_s19 }
  0x14   : > { %5582 = vmatprep.subr.mxu0 %v722_v0  ;;  %v717_v3 = vld [vmem:[%s672_s22] sm:$0xff]  ;;  %v718_v5 = vld [vmem:[%s672_s22 + $0x8] sm:$0xff]  ;;  %v815_v6 = vld [vmem:[%s6258_s28 + $0x18] sm:$0xff]  ;;  %s6284_s18 = sshll.u32 %s6240_s26, 1  ;;  %s6945_s22 = smov 96  }
  0x15   : > { %5583 = vmatpush3.msra.mxu0 %v722_v0  ;;  %5590 = vmatprep.mubr.msk.f32.mxu0 %vm730_vm0, %v717_v3  ;;  %v719_v4 = vld [vmem:[%s677_s30] sm:$0xff]  ;;  %v814_v7 = vld [vmem:[%s6258_s28 + $0x10] sm:$0xff]  ;;  %v813_v8 = vld [vmem:[%s6258_s28 + $0x8] sm:$0xff]  ;;  %s680_s30 = scalar_lea.vmem %s6952_s2, %s6240_s26  ;;  %s6290_s21 = scalar_lea.vmem %s6911_s4, %s6284_s18 }
  0x16   : > { %5584 = vmatprep.subr.mxu0 %v721_v1  ;;  %v812_v9 = vld [vmem:[%s6258_s28] sm:$0xff]  ;;  %s6931_s27 = smov 120   ;;  %s6343_s1 = scalar_lea.vmem %s6912_s5, %s6248_s19 }
  0x17   : > { %5585 = vmatpush3.msra.mxu0 %v721_v1  ;;  %v5255_v11 = vld [vmem:[%s680_s30] ss:$0 sm:$0xff]  ;;  %s6925_s0 = smov 112   ;;  %s6927_s30 = smov 80  }
  0x18   : > { %5586 = vmatprep.subr.mxu0 %v720_v2  ;;  %v5258_v17 = vld [vmem:[%s6290_s21] ss:$0 sm:$0xff] }
  0x19   : > { %5587 = vmatpush3.msra.mxu0 %v720_v2  ;;  %v904_v51 = vld [vmem:[%s6343_s1] sm:$0xff] }
  0x1a   : > { %5588 = vmatprep.subr.mxu0 %v719_v4 }
  0x1b   : > { %5589 = vmatpush3.msra.mxu0 %v719_v4 }
  0x1c   : > { %5591 = vmatmul.mubr.msk.f32.vlgmr.msra.gmra.mxu0 %vm730_vm0, %v718_v5  ;;  %5593 = vmatprep.subr.mxu0 %v815_v6 }
  0x1d   : > { %5594 = vmatpush3.msra.mxu0 %v815_v6 }
  0x1e   : > { %5595 = vmatprep.subr.mxu0 %v814_v7 }
  0x1f   : > { %5596 = vmatpush3.msra.mxu0 %v814_v7 }
  0x20   : > { %5597 = vmatprep.subr.mxu0 %v813_v8 }
  0x21   : > { %5598 = vmatpush3.msra.mxu0 %v813_v8 }
  0x22   : > { %5599 = vmatprep.subr.mxu0 %v812_v9 }
  0x23   : > { %5600 = vmatpush3.msra.mxu0 %v812_v9 }
  0x24   : > { %5604 = vmatprep.subr.mxu0 %v6120_v15 }
  0xdc   : > { %v5592_v10 = vpop.f32.mrf.mxu0 }
  0xdd   : > { %v6271_v14 = vadd.f32 %v5592_v10, %v5255_v11 }
  0xde   : > { %v803_v12 = vpop.f32.mrf.mxu0 }
  0xdf   : > { %v6269_v13 = vadd.f32 %v5255_v11, %v803_v12 }
  0xe1   : > { %5601 = vmatprep.mubr.msk.f32.mxu0 %vm730_vm0, %v6269_v13 }
  0xe2   : > { %5602 = vmatmul.mubr.msk.f32.vlgmr.msra.gmra.mxu0 %vm730_vm0, %v6271_v14 }
  0xe3   : > { %5606 = vmatprep.mubr.msk.f32.mxu0 %vm6121_vm1, %v6120_v15 }
 0x1a2   : > { %v5603_v16 = vpop.f32.mrf.mxu0 }
 0x1a3   : > { %v6297_v20 = vadd.f32 %v5603_v16, %v5258_v17 }
 0x1a4   : > { %v895_v18 = vpop.f32.mrf.mxu0 }
 0x1a5   : > { %v6293_v19 = vadd.f32 %v5258_v17, %v895_v18 }
 0x1a7   : > { %910 = vrot.lane.b32.xlu0 %v6293_v19, %s6945_s22 }
 0x1ab   : > { %988 = vrot.lane.b32.xlu0 %v6297_v20, %s6945_s22  ;;  %s6509_s22 = scalar_lea.vmem %s6915_s8, %s6284_s18 }
 0x219   : > { %v911_v21 = vpop.permute.xlu0 %910 }
 0x21a   : > { %5605 = vmatpush3.xpose.msk.msra.mxu0 %vm912_vm2, %v911_v21 }
 0x21b   : > { %5609 = vmatprep.subr.mxu0 %v6120_v15 }
 0x21d   : > { %5607 = vmatmul.mubr.msk.f32.vlgmr.msra.gmra.mxu0 %vm912_vm2, %v6293_v19  ;;  %v989_v22 = vpop.permute.xlu0 %988 }
 0x21e   : > { %5610 = vmatpush3.xpose.msk.msra.mxu0 %vm912_vm2, %v989_v22  ;;  %5611 = vmatprep.mubr.msk.f32.mxu0 %vm6121_vm1, %v6120_v15 }
 0x21f   : > { %5614 = vmatprep.subr.mxu0 %v6120_v15 }
 0x221   : > { %5612 = vmatmul.mubr.msk.f32.vlgmr.msra.gmra.mxu0 %vm912_vm2, %v6297_v20 }
 0x222   : > { %5616 = vmatprep.mubr.msk.f32.mxu0 %vm6121_vm1, %v6120_v15 }
 0x2dd   : > { %v983_v23 = vpop.f32.mrf.mxu0 }
 0x2de   : > { %v1064_v24 = vmul.f32 0.35355338, %v983_v23 }
 0x2df   : > { %v5608_v25 = vpop.f32.mrf.mxu0 }
 0x2e0   : > { %v1066_v26 = vsel %vm912_vm2, %v1064_v24, -inf }
 0x2e1   : > { %1067 = vmax.xlane.f32.xlu1 %v1066_v26  ;;  %v1060_v27 = vpop.f32.mrf.mxu0 }
 0x2e2   : > { %v1065_v28 = vmul.f32 0.35355338, %v1060_v27 }
 0x2e3   : > { %v5613_v29 = vpop.f32.mrf.mxu0 }
 0x2e4   : > { %v1069_v30 = vsel %vm912_vm2, %v1065_v28, -inf  ;;  %v905_v29 = vld [vmem:[%s6343_s1 + $0x8] sm:$0xff] }
 0x2e5   : > { %1070 = vmax.xlane.f32.xlu1 %v1069_v30 }
 0x2f6   : > { %1088 = vrot.lane.b32.xlu1 %v6293_v19, %s6943_s23 }
 0x36a   : > { %v1068_v31 = vpop.xlane.xlu1 %1067 }
 0x36b   : > { %v1072_v32 = vsub.f32 %v1064_v24, %v1068_v31 }
 0x36d   : > { %v1074_v33 = vmul.f32 1.442695, %v1072_v32 }
 0x36e   : > { %v1071_v34 = vpop.xlane.xlu1 %1070 }
 0x36f   : > { %6020 = vpow2.f32 %v1074_v33  ;;  %v1073_v35 = vsub.f32 %v1065_v28, %v1071_v34 }
 0x371   : > { %v1076_v36 = vmul.f32 1.442695, %v1073_v35 }
 0x372   : > { %v1089_v37 = vpop.permute.xlu1 %1088 }
 0x373   : > { %6022 = vpow2.f32 %v1076_v36  ;;  %5615 = vmatpush3.msra.mxu0 %v1089_v37 }
 0x374   : > { %5624 = vmatprep.subr.mxu0 %v904_v51 }
 0x37c   : > { %v6021_v38 = vpop.eup %6020 }
 0x37d   : > { %v1078_v39 = vsel %vm912_vm2, %v6021_v38, 0.0 }
 0x37e   : > { %1079 = vadd.xlane.f32.xlu0 %v1078_v39 }
 0x380   : > { %v6023_v40 = vpop.eup %6022 }
 0x381   : > { %v1081_v41 = vsel %vm912_vm2, %v6023_v40, 0.0 }
 0x382   : > { %1082 = vadd.xlane.f32.xlu1 %v1081_v41 }
 0x393   : > { %1164 = vrot.lane.b32.xlu1 %v6297_v20, %s6943_s23  ;;  %s6959_s23 = smov 112  }
 0x394   : > { %1329 = vrot.lane.b32.xlu0 %v6293_v19, %s6931_s27 }
 0x397   : > { %1331 = vrot.lane.b32.xlu1 %v6293_v19, %s6941_s29 }
 0x39b   : > { %1409 = vrot.lane.b32.xlu1 %v6297_v20, %s6941_s29  ;;  %s5388_s29 = sshll.u32 %s6240_s26, 8  ;;  %s6957_s26 = smov 56  }
 0x39c   : > { %s6479_s2 = scalar_lea.vmem %s6916_s9, %s5388_s29  ;;  %s6523_s29 = scalar_lea.vmem %s6917_s10, %s6284_s18 }
 0x39f   : > { %1407 = vrot.lane.b32.xlu1 %v6297_v20, %s6931_s27  ;;  %s6933_s27 = smov 104  }
 0x407   : > { %v1080_v42 = vpop.xlane.xlu0 %1079 }
 0x408   : > { %6024 = vrcp.f32 %v1080_v42 }
 0x40b   : > { %v1083_v43 = vpop.xlane.xlu1 %1082  ;;  %v1330_v50 = vpop.permute.xlu0 %1329 }
 0x40c   : > { %6026 = vrcp.f32 %v1083_v43 }
 0x40f   : > { %v1165_v44 = vpop.permute.xlu1 %1164 }
 0x410   : > { %5620 = vmatpush3.msra.mxu1 %v1165_v44 }
 0x411   : > { %5629 = vmatprep.subr.mxu1 %v6120_v15 }
 0x413   : > { %v1332_v49 = vpop.permute.xlu1 %1331 }
 0x415   : > { %v6025_v45 = vpop.eup %6024 }
 0x416   : > { %v1086_v46 = vmul.f32 %v6025_v45, %v6021_v38 }
 0x417   : > { %v1410_v53 = vpop.permute.xlu1 %1409 }
 0x418   : > { %5617 = vmatmul.mubr.msk.f32.vlgmr.msra.gmra.mxu0 %vm912_vm2, %v1086_v46 }
 0x419   : > { %v6027_v47 = vpop.eup %6026  ;;  %5625 = vmatpush3.msra.mxu0 %v904_v51 }
 0x41a   : > { %v1087_v48 = vmul.f32 %v6027_v47, %v6023_v40  ;;  %5634 = vmatprep.subr.mxu0 %v6120_v15 }
 0x41b   : > { %v1408_v57 = vpop.permute.xlu1 %1407 }
 0x41c   : > { %5622 = vmatmul.mubr.msk.f32.vlgmr.msra.gmra.mxu1 %vm912_vm2, %v1087_v48 }
 0x41d   : > { %5630 = vmatpush3.xpose.msk.msra.mxu1 %vm912_vm2, %v1332_v49  ;;  %5631 = vmatprep.mubr.msk.f32.mxu1 %vm6121_vm1, %v6120_v15 }
 0x41e   : > { %5639 = vmatprep.subr.mxu1 %v6120_v15 }
 0x420   : > { %5632 = vmatmul.mubr.msk.f32.vlgmr.msra.gmra.mxu1 %vm912_vm2, %v1330_v50 }
 0x421   : > { %5641 = vmatprep.mubr.msk.f32.mxu1 %vm6121_vm1, %v6120_v15 }
 0x4d8   : > { %v1160_v52 = vpop.f32.mrf.mxu0 }
 0x4d9   : > { %5626 = vmatprep.mubr.msk.f32.mxu0 %vm912_vm2, %v1160_v52 }
 0x4da   : > { %v5618_v54 = vpop.f32.mrf.mxu0 }
 0x4dc   : > { %v1236_v55 = vpop.f32.mrf.mxu1 }
 0x4dd   : > { %5627 = vmatmul.mubr.msk.f32.vlgmr.msra.gmra.mxu0 %vm912_vm2, %v1236_v55 }
 0x4de   : > { %5635 = vmatpush3.xpose.msk.msra.mxu0 %vm912_vm2, %v1410_v53  ;;  %v5623_v56 = vpop.f32.mrf.mxu1  ;;  %5636 = vmatprep.mubr.msk.f32.mxu0 %vm6121_vm1, %v6120_v15 }
 0x4df   : > { %5644 = vmatprep.subr.mxu0 %v6120_v15 }
 0x4e0   : > { %v1403_v58 = vpop.f32.mrf.mxu1 }
 0x4e1   : > { %v1485_v59 = vmul.f32 0.35355338, %v1403_v58  ;;  %5637 = vmatmul.mubr.msk.f32.vlgmr.msra.gmra.mxu0 %vm912_vm2, %v1408_v57 }
 0x4e2   : > { %v5633_v60 = vpop.f32.mrf.mxu1  ;;  %5646 = vmatprep.mubr.msk.f32.mxu0 %vm6121_vm1, %v6120_v15 }
 0x4e3   : > { %v1487_v61 = vsel %vm912_vm2, %v1485_v59, -inf }
 0x4e4   : > { %1488 = vmax.xlane.f32.xlu1 %v1487_v61 }
 0x56d   : > { %v1489_v62 = vpop.xlane.xlu1 %1488 }
 0x56e   : > { %v1493_v63 = vsub.f32 %v1485_v59, %v1489_v62 }
 0x570   : > { %v1495_v0 = vmul.f32 1.442695, %v1493_v63 }
 0x572   : > { %6028 = vpow2.f32 %v1495_v0 }
 0x57f   : > { %v6029_v1 = vpop.eup %6028 }
 0x580   : > { %v1499_v2 = vsel %vm912_vm2, %v6029_v1, 0.0 }
 0x581   : > { %1500 = vadd.xlane.f32.xlu1 %v1499_v2 }
 0x59d   : > { %v6358_v3 = vpop.f32.mrf.mxu0 }
 0x59f   : > { %v6360_v4 = vpop.f32.mrf.mxu0 }
 0x5a1   : > { %v1481_v5 = vpop.f32.mrf.mxu0 }
 0x5a2   : > { %v1486_v6 = vmul.f32 0.35355338, %v1481_v5 }
 0x5a3   : > { %v5638_v7 = vpop.f32.mrf.mxu0 }
 0x5a4   : > { %v1490_v8 = vsel %vm912_vm2, %v1486_v6, -inf }
 0x5a5   : > { %1491 = vmax.xlane.f32.xlu0 %v1490_v8 }
 0x5bb   : > { %1585 = vrot.lane.b32.xlu0 %v6297_v20, %s6929_s20 }
 0x5bf   : > { %1744 = vrot.lane.b32.xlu0 %v6293_v19, %s6925_s0 }
 0x60a   : > { %v1501_v18 = vpop.xlane.xlu1 %1500 }
 0x62e   : > { %v1492_v9 = vpop.xlane.xlu0 %1491 }
 0x62f   : > { %v1494_v10 = vsub.f32 %v1486_v6, %v1492_v9 }
 0x631   : > { %v1497_v11 = vmul.f32 1.442695, %v1494_v10 }
 0x632   : > { %v1586_v12 = vpop.permute.xlu0 %1585 }
 0x633   : > { %6030 = vpow2.f32 %v1497_v11  ;;  %5645 = vmatpush3.msra.mxu0 %v1586_v12 }
 0x634   : > { %5654 = vmatprep.subr.mxu0 %v6120_v15  ;;  %6032 = vrcp.f32 %v1501_v18 }
 0x636   : > { %v1745_v28 = vpop.permute.xlu0 %1744 }
 0x640   : > { %v6031_v16 = vpop.eup %6030 }
 0x641   : > { %v1502_v17 = vsel %vm912_vm2, %v6031_v16, 0.0  ;;  %v6033_v22 = vpop.eup %6032 }
 0x642   : > { %1503 = vadd.xlane.f32.xlu1 %v1502_v17  ;;  %v1507_v24 = vmul.f32 %v6033_v22, %v6029_v1  ;;  %v906_v1 = vld [vmem:[%s6343_s1 + $0x10] sm:$0xff] }
 0x653   : > { %1509 = vrot.lane.b32.xlu1 %v6293_v19, %s6929_s20  ;;  %s6403_s20 = scalar_lea.vmem %s6913_s6, %s6284_s18  ;;  %s6954_s18 = smov 64  }
 0x654   : > { %v5269_v45 = vld [vmem:[%s6403_s20] ss:$0 sm:$0xff] }
 0x655   : > { %v1328_v46 = vadd.f32 %v6358_v3, %v5269_v45  ;;  %v1327_v48 = vadd.f32 %v5269_v45, %v6360_v4 }
 0x657   : > { %1746 = vrot.lane.b32.xlu1 %v6293_v19, %s6927_s30 }
 0x65b   : > { %1824 = vrot.lane.b32.xlu1 %v6297_v20, %s6927_s30  ;;  %s6937_s30 = smov 72  }
 0x65f   : > { %1822 = vrot.lane.b32.xlu1 %v6297_v20, %s6925_s0  ;;  %s6939_s0 = smov 48  }
 0x6cb   : > { %v1504_v21 = vpop.xlane.xlu1 %1503 }
 0x6cc   : > { %6034 = vrcp.f32 %v1504_v21 }
 0x6cf   : > { %v1510_v23 = vpop.permute.xlu1 %1509 }
 0x6d0   : > { %5640 = vmatpush3.msra.mxu1 %v1510_v23 }
 0x6d1   : > { %5642 = vmatmul.mubr.msk.f32.vlgmr.msra.gmra.mxu1 %vm912_vm2, %v1507_v24  ;;  %5649 = vmatprep.subr.mxu1 %v905_v29 }
 0x6d2   : > { %5650 = vmatpush3.msra.mxu1 %v905_v29 }
 0x6d3   : > { %v1747_v27 = vpop.permute.xlu1 %1746  ;;  %5659 = vmatprep.subr.mxu1 %v6120_v15 }
 0x6d7   : > { %v1825_v32 = vpop.permute.xlu1 %1824 }
 0x6d9   : > { %v6035_v25 = vpop.eup %6034 }
 0x6da   : > { %v1508_v26 = vmul.f32 %v6035_v25, %v6031_v16 }
 0x6db   : > { %v1823_v35 = vpop.permute.xlu1 %1822 }
 0x6dc   : > { %5647 = vmatmul.mubr.msk.f32.vlgmr.msra.gmra.mxu0 %vm912_vm2, %v1508_v26 }
 0x6dd   : > { %5655 = vmatpush3.xpose.msk.msra.mxu0 %vm912_vm2, %v1747_v27  ;;  %5656 = vmatprep.mubr.msk.f32.mxu0 %vm6121_vm1, %v6120_v15 }
 0x6de   : > { %5664 = vmatprep.subr.mxu0 %v6120_v15 }
 0x6e0   : > { %5657 = vmatmul.mubr.msk.f32.vlgmr.msra.gmra.mxu0 %vm912_vm2, %v1745_v28 }
 0x6e1   : > { %5666 = vmatprep.mubr.msk.f32.mxu0 %vm6121_vm1, %v6120_v15 }
 0x791   : > { %v1581_v30 = vpop.f32.mrf.mxu1 }
 0x792   : > { %5651 = vmatprep.mubr.msk.f32.mxu1 %vm912_vm2, %v1581_v30 }
 0x793   : > { %v5643_v31 = vpop.f32.mrf.mxu1 }
 0x79c   : > { %v1657_v33 = vpop.f32.mrf.mxu0 }
 0x79d   : > { %5652 = vmatmul.mubr.msk.f32.vlgmr.msra.gmra.mxu1 %vm912_vm2, %v1657_v33 }
 0x79e   : > { %5660 = vmatpush3.xpose.msk.msra.mxu1 %vm912_vm2, %v1825_v32  ;;  %v5648_v34 = vpop.f32.mrf.mxu0  ;;  %5661 = vmatprep.mubr.msk.f32.mxu1 %vm6121_vm1, %v6120_v15 }
 0x79f   : > { %5669 = vmatprep.subr.mxu1 %v6120_v15 }
 0x7a0   : > { %v1818_v36 = vpop.f32.mrf.mxu0 }
 0x7a1   : > { %v1900_v37 = vmul.f32 0.35355338, %v1818_v36  ;;  %5662 = vmatmul.mubr.msk.f32.vlgmr.msra.gmra.mxu1 %vm912_vm2, %v1823_v35 }
 0x7a2   : > { %v5658_v38 = vpop.f32.mrf.mxu0  ;;  %5671 = vmatprep.mubr.msk.f32.mxu1 %vm6121_vm1, %v6120_v15 }
 0x7a3   : > { %v1902_v39 = vsel %vm912_vm2, %v1900_v37, -inf }
 0x7a4   : > { %1903 = vmax.xlane.f32.xlu0 %v1902_v39 }
 0x82d   : > { %v1904_v40 = vpop.xlane.xlu0 %1903 }
 0x82e   : > { %v1908_v41 = vsub.f32 %v1900_v37, %v1904_v40 }
 0x830   : > { %v1910_v42 = vmul.f32 1.442695, %v1908_v41 }
 0x832   : > { %6036 = vpow2.f32 %v1910_v42 }
 0x83f   : > { %v6037_v43 = vpop.eup %6036 }
 0x840   : > { %v1914_v44 = vsel %vm912_vm2, %v6037_v43, 0.0 }
 0x841   : > { %1915 = vadd.xlane.f32.xlu0 %v1914_v44 }
 0x85d   : > { %v5653_v47 = vpop.f32.mrf.mxu1 }
 0x85e   : > { %v6408_v49 = vadd.f32 %v5653_v47, %v1328_v46 }
 0x85f   : > { %v1733_v50 = vpop.f32.mrf.mxu1 }
 0x860   : > { %v6410_v51 = vadd.f32 %v1733_v50, %v1327_v48 }
 0x861   : > { %v1896_v52 = vpop.f32.mrf.mxu1 }
 0x862   : > { %v1901_v53 = vmul.f32 0.35355338, %v1896_v52 }
 0x863   : > { %v5663_v54 = vpop.f32.mrf.mxu1 }
 0x864   : > { %v1905_v55 = vsel %vm912_vm2, %v1901_v53, -inf }
 0x865   : > { %1906 = vmax.xlane.f32.xlu1 %v1905_v55 }
 0x876   : > { %1924 = vrot.lane.b32.xlu1 %v6293_v19, %s6939_s0 }
 0x87a   : > { %2161 = vrot.lane.b32.xlu1 %v6293_v19, %s6937_s30 }
 0x87e   : > { %2239 = vrot.lane.b32.xlu1 %v6297_v20, %s6937_s30  ;;  %s6956_s30 = smov 120  }
 0x882   : > { %2237 = vrot.lane.b32.xlu1 %v6297_v20, %s6933_s27 }
 0x8ca   : > { %v1916_v56 = vpop.xlane.xlu0 %1915 }
 0x8cb   : > { %6038 = vrcp.f32 %v1916_v56  ;;  %v2685_v56 = vld [vmem:[%s6479_s2 + $0x78] sm:$0xff] }
 0x8d8   : > { %v6039_v58 = vpop.eup %6038 }
 0x8d9   : > { %v1922_v62 = vmul.f32 %v6039_v58, %v6037_v43  ;;  %v2683_v58 = vld [vmem:[%s6479_s2 + $0x68] sm:$0xff] }
 0x8ee   : > { %v1907_v57 = vpop.xlane.xlu1 %1906 }
 0x8ef   : > { %v1909_v59 = vsub.f32 %v1901_v53, %v1907_v57  ;;  %v2684_v57 = vld [vmem:[%s6479_s2 + $0x70] sm:$0xff] }
 0x8f1   : > { %v1912_v60 = vmul.f32 1.442695, %v1909_v59  ;;  %v2682_v59 = vld [vmem:[%s6479_s2 + $0x60] sm:$0xff] }
 0x8f2   : > { %v1925_v61 = vpop.permute.xlu1 %1924 }
 0x8f3   : > { %6040 = vpow2.f32 %v1912_v60  ;;  %5665 = vmatpush3.msra.mxu0 %v1925_v61  ;;  %v2681_v60 = vld [vmem:[%s6479_s2 + $0x58] sm:$0xff]  ;;  %v2680_v61 = vld [vmem:[%s6479_s2 + $0x50] sm:$0xff] }
 0x8f4   : > { %5667 = vmatmul.mubr.msk.f32.vlgmr.msra.gmra.mxu0 %vm912_vm2, %v1922_v62  ;;  %5674 = vmatprep.subr.mxu0 %v906_v1  ;;  %v2679_v62 = vld [vmem:[%s6479_s2 + $0x48] sm:$0xff] }
 0x8f5   : > { %5675 = vmatpush3.msra.mxu0 %v906_v1  ;;  %v2676_v1 = vld [vmem:[%s6479_s2 + $0x30] sm:$0xff] }
 0x8f6   : > { %5684 = vmatprep.subr.mxu0 %v6120_v15  ;;  %v2162_v6 = vpop.permute.xlu1 %2161 }
 0x8fa   : > { %v2240_v10 = vpop.permute.xlu1 %2239 }
 0x8fe   : > { %v2238_v16 = vpop.permute.xlu1 %2237 }
 0x900   : > { %v6041_v63 = vpop.eup %6040 }
 0x901   : > { %v1917_v0 = vsel %vm912_vm2, %v6041_v63, 0.0 }
 0x902   : > { %1918 = vadd.xlane.f32.xlu0 %v1917_v0  ;;  %v2677_v0 = vld [vmem:[%s6479_s2 + $0x38] sm:$0xff] }
 0x918   : > { %2000 = vrot.lane.b32.xlu0 %v6297_v20, %s6939_s0  ;;  %s6470_s0 = scalar_lea.vmem %s6914_s7, %s6248_s19  ;;  %s6958_s19 = smov 80  }
 0x919   : > { %v2579_v52 = vld [vmem:[%s6470_s0 + $0x18] sm:$0xff]  ;;  %v2578_v53 = vld [vmem:[%s6470_s0 + $0x10] sm:$0xff]  ;;  %v2577_v54 = vld [vmem:[%s6470_s0 + $0x8] sm:$0xff] }
 0x91a   : > { %v2576_v55 = vld [vmem:[%s6470_s0] sm:$0xff] }
 0x91c   : > { %2159 = vrot.lane.b32.xlu0 %v6293_v19, %s6933_s27  ;;  %s6935_s27 = smov 40  }
 0x98b   : > { %v1919_v2 = vpop.xlane.xlu0 %1918 }
 0x98c   : > { %6042 = vrcp.f32 %v1919_v2  ;;  %v2675_v2 = vld [vmem:[%s6479_s2 + $0x28] sm:$0xff] }
 0x98f   : > { %v2001_v3 = vpop.permute.xlu0 %2000 }
 0x990   : > { %5670 = vmatpush3.msra.mxu1 %v2001_v3  ;;  %v2674_v3 = vld [vmem:[%s6479_s2 + $0x20] sm:$0xff] }
 0x991   : > { %5679 = vmatprep.subr.mxu1 %v6120_v15 }
 0x993   : > { %v2160_v7 = vpop.permute.xlu0 %2159 }
 0x999   : > { %v6043_v4 = vpop.eup %6042 }
 0x99a   : > { %v1923_v5 = vmul.f32 %v6043_v4, %v6041_v63  ;;  %v2678_v63 = vld [vmem:[%s6479_s2 + $0x40] sm:$0xff] }
 0x99c   : > { %5672 = vmatmul.mubr.msk.f32.vlgmr.msra.gmra.mxu1 %vm912_vm2, %v1923_v5 }
 0x99d   : > { %5680 = vmatpush3.xpose.msk.msra.mxu1 %vm912_vm2, %v2162_v6  ;;  %5681 = vmatprep.mubr.msk.f32.mxu1 %vm6121_vm1, %v6120_v15 }
 0x99e   : > { %5689 = vmatprep.subr.mxu1 %v6120_v15 }
 0x9a0   : > { %5682 = vmatmul.mubr.msk.f32.vlgmr.msra.gmra.mxu1 %vm912_vm2, %v2160_v7 }
 0x9a1   : > { %5691 = vmatprep.mubr.msk.f32.mxu1 %vm6121_vm1, %v6120_v15 }
 0x9b4   : > { %v1996_v8 = vpop.f32.mrf.mxu0 }
 0x9b5   : > { %5676 = vmatprep.mubr.msk.f32.mxu0 %vm912_vm2, %v1996_v8 }
 0x9b6   : > { %v5668_v9 = vpop.f32.mrf.mxu0 }
 0xa5c   : > { %v2072_v11 = vpop.f32.mrf.mxu1 }
 0xa5d   : > { %5677 = vmatmul.mubr.msk.f32.vlgmr.msra.gmra.mxu0 %vm912_vm2, %v2072_v11  ;;  %v2672_v11 = vld [vmem:[%s6479_s2 + $0x10] sm:$0xff] }
 0xa5e   : > { %5685 = vmatpush3.xpose.msk.msra.mxu0 %vm912_vm2, %v2240_v10  ;;  %v5673_v12 = vpop.f32.mrf.mxu1  ;;  %5686 = vmatprep.mubr.msk.f32.mxu0 %vm6121_vm1, %v6120_v15  ;;  %v2673_v10 = vld [vmem:[%s6479_s2 + $0x18] sm:$0xff] }
 0xa5f   : > { %5694 = vmatprep.subr.mxu0 %v6120_v15  ;;  %v2671_v12 = vld [vmem:[%s6479_s2 + $0x8] sm:$0xff] }
 0xa60   : > { %v2233_v17 = vpop.f32.mrf.mxu1 }
 0xa61   : > { %v2315_v18 = vmul.f32 0.35355338, %v2233_v17  ;;  %5687 = vmatmul.mubr.msk.f32.vlgmr.msra.gmra.mxu0 %vm912_vm2, %v2238_v16  ;;  %v2670_v16 = vld [vmem:[%s6479_s2] sm:$0xff] }
 0xa62   : > { %v5683_v21 = vpop.f32.mrf.mxu1  ;;  %5696 = vmatprep.mubr.msk.f32.mxu0 %vm6121_vm1, %v6120_v15 }
 0xa63   : > { %v2317_v22 = vsel %vm912_vm2, %v2315_v18, -inf }
 0xa64   : > { %2318 = vmax.xlane.f32.xlu0 %v2317_v22 }
 0xaed   : > { %v2319_v23 = vpop.xlane.xlu0 %2318 }
 0xaee   : > { %v2323_v24 = vsub.f32 %v2315_v18, %v2319_v23 }
 0xaf0   : > { %v2325_v25 = vmul.f32 1.442695, %v2323_v24  ;;  %v5301_v24 = vld [vmem:[%s6258_s28 + $0x38] sm:$0xff] }
 0xaf2   : > { %6044 = vpow2.f32 %v2325_v25  ;;  %v5300_v25 = vld [vmem:[%s6258_s28 + $0x30] sm:$0xff] }
 0xaff   : > { %v6045_v26 = vpop.eup %6044 }
 0xb00   : > { %v2329_v27 = vsel %vm912_vm2, %v6045_v26, 0.0 }
 0xb01   : > { %2330 = vadd.xlane.f32.xlu0 %v2329_v27  ;;  %v5298_v27 = vld [vmem:[%s6258_s28 + $0x20] sm:$0xff] }
 0xb1d   : > { %v5678_v28 = vpop.f32.mrf.mxu0 }
 0xb1e   : > { %v6450_v29 = vadd.f32 %v5678_v28, %v6408_v49  ;;  %v5297_v28 = vld [vmem:[%s6523_s29] ss:$0 sm:$0xff] }
 0xb1f   : > { %v2148_v30 = vpop.f32.mrf.mxu0 }
 0xb20   : > { %v6453_v31 = vadd.f32 %v2148_v30, %v6410_v51 }
 0xb21   : > { %v2311_v32 = vpop.f32.mrf.mxu0 }
 0xb22   : > { %v2316_v33 = vmul.f32 0.35355338, %v2311_v32 }
 0xb23   : > { %v5688_v34 = vpop.f32.mrf.mxu0 }
 0xb24   : > { %v2320_v35 = vsel %vm912_vm2, %v2316_v33, -inf }
 0xb25   : > { %2321 = vmax.xlane.f32.xlu1 %v2320_v35 }
 0xb36   : > { %2339 = vrot.lane.b32.xlu1 %v6293_v19, %s6935_s27  ;;  %v907_v19 = vld [vmem:[%s6343_s1 + $0x18] sm:$0xff] }
 0xb8a   : > { %v2331_v36 = vpop.xlane.xlu0 %2330 }
 0xb8b   : > { %6046 = vrcp.f32 %v2331_v36  ;;  %v5303_v36 = vld [vmem:[%s6290_s21 + $0x1] ss:$0 sm:$0xff]  ;;  %s6955_s21 = smov 88  }
 0xb98   : > { %v6047_v38 = vpop.eup %6046 }
 0xb99   : > { %v2337_v42 = vmul.f32 %v6047_v38, %v6045_v26  ;;  %v5299_v26 = vld [vmem:[%s6258_s28 + $0x28] sm:$0xff]  ;;  %s6953_s28 = smov 96  }
 0xbae   : > { %v2322_v37 = vpop.xlane.xlu1 %2321 }
 0xbaf   : > { %v2324_v39 = vsub.f32 %v2316_v33, %v2322_v37 }
 0xbb1   : > { %v2327_v40 = vmul.f32 1.442695, %v2324_v39 }
 0xbb2   : > { %v2340_v41 = vpop.permute.xlu1 %2339 }
 0xbb3   : > { %6048 = vpow2.f32 %v2327_v40  ;;  %5690 = vmatpush3.msra.mxu1 %v2340_v41 }
 0xbb4   : > { %5692 = vmatmul.mubr.msk.f32.vlgmr.msra.gmra.mxu1 %vm912_vm2, %v2337_v42  ;;  %5699 = vmatprep.subr.mxu1 %v907_v19 }
 0xbb5   : > { %5700 = vmatpush3.msra.mxu1 %v907_v19 }
 0xbb6   : > { %5715 = vmatprep.subr.mxu1 %v2685_v56 }
 0xbc0   : > { %v6049_v43 = vpop.eup %6048 }
 0xbc1   : > { %v2332_v44 = vsel %vm912_vm2, %v6049_v43, 0.0 }
 0xbc2   : > { %2333 = vadd.xlane.f32.xlu0 %v2332_v44 }
 0xbd8   : > { %2415 = vrot.lane.b32.xlu0 %v6297_v20, %s6935_s27  ;;  %s6960_s27 = smov 48  }
 0xc4b   : > { %v2334_v45 = vpop.xlane.xlu0 %2333 }
 0xc4c   : > { %6050 = vrcp.f32 %v2334_v45 }
 0xc4f   : > { %v2416_v46 = vpop.permute.xlu0 %2415 }
 0xc50   : > { %5695 = vmatpush3.msra.mxu0 %v2416_v46 }
 0xc51   : > { %5704 = vmatprep.subr.mxu0 %v2579_v52 }
 0xc59   : > { %v6051_v47 = vpop.eup %6050 }
 0xc5a   : > { %v2338_v48 = vmul.f32 %v6051_v47, %v6049_v43 }
 0xc5c   : > { %5697 = vmatmul.mubr.msk.f32.vlgmr.msra.gmra.mxu0 %vm912_vm2, %v2338_v48 }
 0xc5d   : > { %5705 = vmatpush3.msra.mxu0 %v2579_v52 }
 0xc5e   : > { %5706 = vmatprep.subr.mxu0 %v2578_v53 }
 0xc5f   : > { %5707 = vmatpush3.msra.mxu0 %v2578_v53 }
 0xc60   : > { %5708 = vmatprep.subr.mxu0 %v2577_v54 }
 0xc61   : > { %5709 = vmatpush3.msra.mxu0 %v2577_v54 }
 0xc62   : > { %5710 = vmatprep.subr.mxu0 %v2576_v55 }
 0xc63   : > { %5711 = vmatpush3.msra.mxu0 %v2576_v55 }
 0xc64   : > { %5750 = vmatprep.subr.mxu0 %v5301_v24 }
 0xc74   : > { %v2411_v49 = vpop.f32.mrf.mxu1 }
 0xc75   : > { %5701 = vmatprep.mubr.msk.f32.mxu1 %vm912_vm2, %v2411_v49 }
 0xc76   : > { %v5693_v50 = vpop.f32.mrf.mxu1 }
 0xd1c   : > { %v2487_v51 = vpop.f32.mrf.mxu0 }
 0xd1d   : > { %5702 = vmatmul.mubr.msk.f32.vlgmr.msra.gmra.mxu1 %vm912_vm2, %v2487_v51 }
 0xd1e   : > { %v5698_v20 = vpop.f32.mrf.mxu0  ;;  %5716 = vmatpush3.msra.mxu1 %v2685_v56 }
 0xd1f   : > { %5717 = vmatprep.subr.mxu1 %v2684_v57 }
 0xd20   : > { %5718 = vmatpush3.msra.mxu1 %v2684_v57 }
 0xd21   : > { %5719 = vmatprep.subr.mxu1 %v2683_v58 }
 0xd22   : > { %5720 = vmatpush3.msra.mxu1 %v2683_v58 }
 0xd23   : > { %5721 = vmatprep.subr.mxu1 %v2682_v59 }
 0xd24   : > { %5722 = vmatpush3.msra.mxu1 %v2682_v59 }
 0xd25   : > { %5723 = vmatprep.subr.mxu1 %v2681_v60 }
 0xd26   : > { %5724 = vmatpush3.msra.mxu1 %v2681_v60 }
 0xd27   : > { %5725 = vmatprep.subr.mxu1 %v2680_v61 }
 0xd28   : > { %5726 = vmatpush3.msra.mxu1 %v2680_v61 }
 0xd29   : > { %5727 = vmatprep.subr.mxu1 %v2679_v62 }
 0xd2a   : > { %5728 = vmatpush3.msra.mxu1 %v2679_v62 }
 0xd2b   : > { %5729 = vmatprep.subr.mxu1 %v2678_v63 }
 0xd2c   : > { %5730 = vmatpush3.msra.mxu1 %v2678_v63 }
 0xd2d   : > { %5731 = vmatprep.subr.mxu1 %v2677_v0 }
 0xd2e   : > { %5732 = vmatpush3.msra.mxu1 %v2677_v0 }
 0xd2f   : > { %5733 = vmatprep.subr.mxu1 %v2676_v1 }
 0xd30   : > { %5734 = vmatpush3.msra.mxu1 %v2676_v1 }
 0xd31   : > { %5735 = vmatprep.subr.mxu1 %v2675_v2 }
 0xd32   : > { %5736 = vmatpush3.msra.mxu1 %v2675_v2 }
 0xd33   : > { %5737 = vmatprep.subr.mxu1 %v2674_v3 }
 0xd34   : > { %5738 = vmatpush3.msra.mxu1 %v2674_v3 }
 0xd35   : > { %5739 = vmatprep.subr.mxu1 %v2673_v10 }
 0xd36   : > { %5740 = vmatpush3.msra.mxu1 %v2673_v10 }
 0xd37   : > { %5741 = vmatprep.subr.mxu1 %v2672_v11 }
 0xd38   : > { %5742 = vmatpush3.msra.mxu1 %v2672_v11 }
 0xd39   : > { %5743 = vmatprep.subr.mxu1 %v2671_v12 }
 0xd3a   : > { %5744 = vmatpush3.msra.mxu1 %v2671_v12 }
 0xd3b   : > { %5745 = vmatprep.subr.mxu1 %v2670_v16 }
 0xd3c   : > { %5746 = vmatpush3.msra.mxu1 %v2670_v16 }
 0xd3d   : > { %5786 = vmatprep.subr.mxu1 %v6120_v15 }
 0xddd   : > { %v5703_v4 = vpop.f32.mrf.mxu1 }
 0xdde   : > { %v2573_v5 = vadd.f32 %v5703_v4, %v6450_v29  ;;  %v5306_v4 = vld [vmem:[%s6343_s1 + $0x20] sm:$0xff] }
 0xddf   : > { %v2563_v6 = vpop.f32.mrf.mxu1 }
 0xde0   : > { %v2572_v7 = vadd.f32 %v2563_v6, %v6453_v31  ;;  %v2575_v9 = vadd.f32 %v2573_v5, %v6271_v14 }
 0xde2   : > { %v2574_v8 = vadd.f32 %v2572_v7, %v6269_v13  ;;  %v5294_v13 = vld [vmem:[%s6509_s22] ss:$0 sm:$0xff] }
 0xde4   : > { %5712 = vmatprep.mubr.msk.f32.mxu0 %vm730_vm0, %v2574_v8 }
 0xde5   : > { %5713 = vmatmul.mubr.msk.f32.vlgmr.msra.gmra.mxu0 %vm730_vm0, %v2575_v9 }
 0xde6   : > { %5751 = vmatpush3.msra.mxu0 %v5301_v24 }
 0xde7   : > { %5752 = vmatprep.subr.mxu0 %v5300_v25 }
 0xde8   : > { %5753 = vmatpush3.msra.mxu0 %v5300_v25 }
 0xde9   : > { %5754 = vmatprep.subr.mxu0 %v5299_v26 }
 0xdea   : > { %5755 = vmatpush3.msra.mxu0 %v5299_v26 }
 0xdeb   : > { %5756 = vmatprep.subr.mxu0 %v5298_v27 }
 0xdec   : > { %5757 = vmatpush3.msra.mxu0 %v5298_v27 }
 0xded   : > { %5761 = vmatprep.subr.mxu0 %v6120_v15 }
 0xea5   : > { %v5714_v14 = vpop.f32.mrf.mxu0 }
 0xea6   : > { %v2665_v17 = vadd.f32 %v5714_v14, %v5294_v13 }
 0xea7   : > { %v2659_v18 = vpop.f32.mrf.mxu0 }
 0xea8   : > { %v2660_v21 = vadd.f32 %v5294_v13, %v2659_v18  ;;  %v2669_v23 = vmax.f32 %v2665_v17, 0.0 }
 0xeaa   : > { %v2668_v22 = vmax.f32 %v2660_v21, 0.0 }
 0xeac   : > { %5747 = vmatprep.mubr.f32.mxu1 %v2668_v22 }
 0xead   : > { %5748 = vmatmul.mubr.f32.vlgmr.msra.gmra.mxu1 %v2669_v23 }
 0xeae   : > { %5788 = vmatprep.mubr.msk.f32.mxu1 %vm6121_vm1, %v6120_v15 }
 0xf6d   : > { %v5749_v29 = vpop.f32.mrf.mxu1 }
 0xf6e   : > { %v2765_v30 = vadd.f32 %v5749_v29, %v5297_v28 }
 0xf6f   : > { %v2759_v31 = vpop.f32.mrf.mxu1 }
 0xf70   : > { %v2760_v32 = vadd.f32 %v5297_v28, %v2759_v31  ;;  %v6528_v34 = vadd.f32 %v2765_v30, %v2575_v9 }
 0xf72   : > { %v6526_v33 = vadd.f32 %v2760_v32, %v2574_v8 }
 0xf74   : > { %5758 = vmatprep.mubr.msk.f32.mxu0 %vm730_vm0, %v6526_v33 }
 0xf75   : > { %5759 = vmatmul.mubr.msk.f32.vlgmr.msra.gmra.mxu0 %vm730_vm0, %v6528_v34 }
 0xf76   : > { %5763 = vmatprep.mubr.msk.f32.mxu0 %vm6121_vm1, %v6120_v15 }
0x1035   : > { %v5760_v35 = vpop.f32.mrf.mxu0 }
0x1036   : > { %v6541_v39 = vadd.f32 %v5760_v35, %v5303_v36 }
0x1037   : > { %v2855_v37 = vpop.f32.mrf.mxu0 }
0x1038   : > { %v6537_v38 = vadd.f32 %v5303_v36, %v2855_v37 }
0x103a   : > { %2872 = vrot.lane.b32.xlu1 %v6537_v38, %s6953_s28 }
0x103e   : > { %2949 = vrot.lane.b32.xlu1 %v6541_v39, %s6953_s28  ;;  %s6962_s28 = smov 104  }
0x10ac   : > { %v2873_v40 = vpop.permute.xlu1 %2872 }
0x10ad   : > { %5762 = vmatpush3.xpose.msk.msra.mxu0 %vm912_vm2, %v2873_v40 }
0x10ae   : > { %5766 = vmatprep.subr.mxu0 %v6120_v15 }
0x10b0   : > { %5764 = vmatmul.mubr.msk.f32.vlgmr.msra.gmra.mxu0 %vm912_vm2, %v6537_v38  ;;  %v2950_v41 = vpop.permute.xlu1 %2949 }
0x10b1   : > { %5767 = vmatpush3.xpose.msk.msra.mxu0 %vm912_vm2, %v2950_v41  ;;  %5768 = vmatprep.mubr.msk.f32.mxu0 %vm6121_vm1, %v6120_v15 }
0x10b2   : > { %5771 = vmatprep.subr.mxu0 %v6120_v15 }
0x10b4   : > { %5769 = vmatmul.mubr.msk.f32.vlgmr.msra.gmra.mxu0 %vm912_vm2, %v6541_v39 }
0x10b5   : > { %5773 = vmatprep.mubr.msk.f32.mxu0 %vm6121_vm1, %v6120_v15 }
0x1170   : > { %v2944_v42 = vpop.f32.mrf.mxu0 }
0x1171   : > { %v3025_v43 = vmul.f32 0.35355338, %v2944_v42  ;;  %v5307_v42 = vld [vmem:[%s6343_s1 + $0x28] sm:$0xff] }
0x1172   : > { %v5765_v44 = vpop.f32.mrf.mxu0 }
0x1173   : > { %v3027_v19 = vsel %vm912_vm2, %v3025_v43, -inf }
0x1174   : > { %3028 = vmax.xlane.f32.xlu0 %v3027_v19  ;;  %v3021_v45 = vpop.f32.mrf.mxu0 }
0x1175   : > { %v3026_v46 = vmul.f32 0.35355338, %v3021_v45 }
0x1176   : > { %v5770_v47 = vpop.f32.mrf.mxu0 }
0x1177   : > { %v3030_v48 = vsel %vm912_vm2, %v3026_v46, -inf }
0x1178   : > { %3031 = vmax.xlane.f32.xlu1 %v3030_v48 }
0x1189   : > { %3049 = vrot.lane.b32.xlu1 %v6537_v38, %s6954_s18 }
0x118d   : > { %3292 = vrot.lane.b32.xlu1 %v6537_v38, %s6955_s21 }
0x1191   : > { %3370 = vrot.lane.b32.xlu1 %v6541_v39, %s6955_s21 }
0x1195   : > { %3368 = vrot.lane.b32.xlu1 %v6541_v39, %s6956_s30 }
0x11fd   : > { %v3029_v49 = vpop.xlane.xlu0 %3028 }
0x11fe   : > { %v3033_v50 = vsub.f32 %v3025_v43, %v3029_v49 }
0x1200   : > { %v3035_v51 = vmul.f32 1.442695, %v3033_v50 }
0x1201   : > { %v3032_v20 = vpop.xlane.xlu1 %3031 }
0x1202   : > { %6052 = vpow2.f32 %v3035_v51  ;;  %v3034_v52 = vsub.f32 %v3026_v46, %v3032_v20 }
0x1204   : > { %v3037_v53 = vmul.f32 1.442695, %v3034_v52 }
0x1205   : > { %v3050_v54 = vpop.permute.xlu1 %3049 }
0x1206   : > { %6054 = vpow2.f32 %v3037_v53  ;;  %5772 = vmatpush3.msra.mxu0 %v3050_v54 }
0x1207   : > { %5776 = vmatprep.subr.mxu0 %v6120_v15 }
0x1209   : > { %v3293_v55 = vpop.permute.xlu1 %3292 }
0x120a   : > { %5787 = vmatpush3.xpose.msk.msra.mxu1 %vm912_vm2, %v3293_v55 }
0x120b   : > { %5796 = vmatprep.subr.mxu1 %v6120_v15 }
0x120d   : > { %v3371_v10 = vpop.permute.xlu1 %3370 }
0x120f   : > { %v6053_v56 = vpop.eup %6052 }
0x1210   : > { %v3039_v57 = vsel %vm912_vm2, %v6053_v56, 0.0 }
0x1211   : > { %3040 = vadd.xlane.f32.xlu0 %v3039_v57  ;;  %v3369_v13 = vpop.permute.xlu1 %3368 }
0x1213   : > { %v6055_v58 = vpop.eup %6054 }
0x1214   : > { %v3042_v59 = vsel %vm912_vm2, %v6055_v58, 0.0 }
0x1215   : > { %3043 = vadd.xlane.f32.xlu0 %v3042_v59 }
0x122b   : > { %3125 = vrot.lane.b32.xlu0 %v6541_v39, %s6954_s18  ;;  %s6963_s18 = smov 40  }
0x122f   : > { %3290 = vrot.lane.b32.xlu0 %v6537_v38, %s6956_s30 }
0x129a   : > { %v3041_v60 = vpop.xlane.xlu0 %3040 }
0x129b   : > { %6056 = vrcp.f32 %v3041_v60 }
0x129e   : > { %v3044_v61 = vpop.xlane.xlu0 %3043 }
0x129f   : > { %6058 = vrcp.f32 %v3044_v61 }
0x12a2   : > { %v3126_v62 = vpop.permute.xlu0 %3125 }
0x12a6   : > { %v3291_v63 = vpop.permute.xlu0 %3290 }
0x12a7   : > { %5789 = vmatmul.mubr.msk.f32.vlgmr.msra.gmra.mxu1 %vm912_vm2, %v3291_v63 }
0x12a8   : > { %v6057_v0 = vpop.eup %6056  ;;  %5798 = vmatprep.mubr.msk.f32.mxu1 %vm6121_vm1, %v6120_v15 }
0x12a9   : > { %v3047_v1 = vmul.f32 %v6057_v0, %v6053_v56 }
0x12ab   : > { %5774 = vmatmul.mubr.msk.f32.vlgmr.msra.gmra.mxu0 %vm912_vm2, %v3047_v1 }
0x12ac   : > { %v6059_v2 = vpop.eup %6058  ;;  %5777 = vmatpush3.msra.mxu0 %v3126_v62  ;;  %5778 = vmatprep.mubr.msk.f32.mxu0 %vm6121_vm1, %v6120_v15  ;;  %v5319_v62 = vld [vmem:[%s6403_s20 + $0x1] ss:$0 sm:$0xff]  ;;  %s6961_s20 = smov 72  }
0x12ad   : > { %v3048_v3 = vmul.f32 %v6059_v2, %v6055_v58  ;;  %5781 = vmatprep.subr.mxu0 %v5306_v4 }
0x12af   : > { %5779 = vmatmul.mubr.msk.f32.vlgmr.msra.gmra.mxu0 %vm912_vm2, %v3048_v3 }
0x12b0   : > { %5782 = vmatpush3.msra.mxu0 %v5306_v4 }
0x12b1   : > { %5791 = vmatprep.subr.mxu0 %v6120_v15 }
0x1367   : > { %v3364_v5 = vpop.f32.mrf.mxu1 }
0x1368   : > { %v3446_v6 = vmul.f32 0.35355338, %v3364_v5 }
0x1369   : > { %v5790_v7 = vpop.f32.mrf.mxu1 }
0x136a   : > { %v3448_v8 = vsel %vm912_vm2, %v3446_v6, -inf }
0x136b   : > { %3449 = vmax.xlane.f32.xlu0 %v3448_v8  ;;  %v3121_v9 = vpop.f32.mrf.mxu0 }
0x136c   : > { %5783 = vmatprep.mubr.msk.f32.mxu0 %vm912_vm2, %v3121_v9 }
0x136d   : > { %v5775_v11 = vpop.f32.mrf.mxu0 }
0x136f   : > { %v3197_v12 = vpop.f32.mrf.mxu0 }
0x1370   : > { %5784 = vmatmul.mubr.msk.f32.vlgmr.msra.gmra.mxu0 %vm912_vm2, %v3197_v12 }
0x1371   : > { %5792 = vmatpush3.xpose.msk.msra.mxu0 %vm912_vm2, %v3371_v10  ;;  %v5780_v16 = vpop.f32.mrf.mxu0  ;;  %5793 = vmatprep.mubr.msk.f32.mxu0 %vm6121_vm1, %v6120_v15 }
0x1372   : > { %5801 = vmatprep.subr.mxu0 %v6120_v15 }
0x1374   : > { %5794 = vmatmul.mubr.msk.f32.vlgmr.msra.gmra.mxu0 %vm912_vm2, %v3369_v13 }
0x1375   : > { %5803 = vmatprep.mubr.msk.f32.mxu0 %vm6121_vm1, %v6120_v15 }
0x13f4   : > { %v3450_v14 = vpop.xlane.xlu0 %3449 }
0x13f5   : > { %v3454_v17 = vsub.f32 %v3446_v6, %v3450_v14 }
0x13f7   : > { %v3456_v18 = vmul.f32 1.442695, %v3454_v17 }
0x13f9   : > { %6060 = vpow2.f32 %v3456_v18 }
0x1406   : > { %v6061_v21 = vpop.eup %6060 }
0x1407   : > { %v3460_v22 = vsel %vm912_vm2, %v6061_v21, 0.0 }
0x1408   : > { %3461 = vadd.xlane.f32.xlu0 %v3460_v22 }
0x1430   : > { %v6596_v23 = vpop.f32.mrf.mxu0 }
0x1431   : > { %v3289_v63 = vadd.f32 %v6596_v23, %v5319_v62 }
0x1432   : > { %v6598_v24 = vpop.f32.mrf.mxu0 }
0x1433   : > { %v3288_v1 = vadd.f32 %v5319_v62, %v6598_v24 }
0x1434   : > { %v3442_v25 = vpop.f32.mrf.mxu0 }
0x1435   : > { %v3447_v26 = vmul.f32 0.35355338, %v3442_v25 }
0x1436   : > { %v5795_v27 = vpop.f32.mrf.mxu0 }
0x1437   : > { %v3451_v28 = vsel %vm912_vm2, %v3447_v26, -inf }
0x1438   : > { %3452 = vmax.xlane.f32.xlu1 %v3451_v28 }
0x1449   : > { %3470 = vrot.lane.b32.xlu1 %v6537_v38, %s6957_s26 }
0x144d   : > { %3707 = vrot.lane.b32.xlu1 %v6537_v38, %s6958_s19 }
0x1451   : > { %3785 = vrot.lane.b32.xlu1 %v6541_v39, %s6958_s19 }
0x1455   : > { %3783 = vrot.lane.b32.xlu1 %v6541_v39, %s6959_s23 }
0x1491   : > { %v3462_v29 = vpop.xlane.xlu0 %3461 }
0x1492   : > { %6062 = vrcp.f32 %v3462_v29 }
0x149f   : > { %v6063_v31 = vpop.eup %6062 }
0x14a0   : > { %v3468_v37 = vmul.f32 %v6063_v31, %v6061_v21  ;;  %v5308_v21 = vld [vmem:[%s6343_s1 + $0x30] sm:$0xff] }
0x14c1   : > { %v3453_v30 = vpop.xlane.xlu1 %3452 }
0x14c2   : > { %v3455_v32 = vsub.f32 %v3447_v26, %v3453_v30 }
0x14c4   : > { %v3458_v35 = vmul.f32 1.442695, %v3455_v32 }
0x14c5   : > { %v3471_v36 = vpop.permute.xlu1 %3470 }
0x14c6   : > { %6064 = vpow2.f32 %v3458_v35  ;;  %5797 = vmatpush3.msra.mxu1 %v3471_v36 }
0x14c7   : > { %5799 = vmatmul.mubr.msk.f32.vlgmr.msra.gmra.mxu1 %vm912_vm2, %v3468_v37  ;;  %5806 = vmatprep.subr.mxu1 %v5307_v42 }
0x14c8   : > { %5807 = vmatpush3.msra.mxu1 %v5307_v42 }
0x14c9   : > { %5816 = vmatprep.subr.mxu1 %v6120_v15  ;;  %v3708_v46 = vpop.permute.xlu1 %3707 }
0x14cd   : > { %v3786_v50 = vpop.permute.xlu1 %3785 }
0x14d1   : > { %v3784_v52 = vpop.permute.xlu1 %3783 }
0x14d3   : > { %v6065_v40 = vpop.eup %6064 }
0x14d4   : > { %v3463_v41 = vsel %vm912_vm2, %v6065_v40, 0.0 }
0x14d5   : > { %3464 = vadd.xlane.f32.xlu0 %v3463_v41 }
0x14eb   : > { %3546 = vrot.lane.b32.xlu0 %v6541_v39, %s6957_s26 }
0x14ef   : > { %3705 = vrot.lane.b32.xlu0 %v6537_v38, %s6959_s23 }
0x155e   : > { %v3465_v43 = vpop.xlane.xlu0 %3464 }
0x155f   : > { %6066 = vrcp.f32 %v3465_v43 }
0x1562   : > { %v3547_v44 = vpop.permute.xlu0 %3546 }
0x1563   : > { %5802 = vmatpush3.msra.mxu0 %v3547_v44 }
0x1564   : > { %5811 = vmatprep.subr.mxu0 %v6120_v15 }
0x1566   : > { %v3706_v47 = vpop.permute.xlu0 %3705 }
0x156c   : > { %v6067_v19 = vpop.eup %6066 }
0x156d   : > { %v3469_v45 = vmul.f32 %v6067_v19, %v6065_v40 }
0x156f   : > { %5804 = vmatmul.mubr.msk.f32.vlgmr.msra.gmra.mxu0 %vm912_vm2, %v3469_v45 }
0x1570   : > { %5812 = vmatpush3.xpose.msk.msra.mxu0 %vm912_vm2, %v3708_v46  ;;  %5813 = vmatprep.mubr.msk.f32.mxu0 %vm6121_vm1, %v6120_v15 }
0x1571   : > { %5821 = vmatprep.subr.mxu0 %v6120_v15 }
0x1573   : > { %5814 = vmatmul.mubr.msk.f32.vlgmr.msra.gmra.mxu0 %vm912_vm2, %v3706_v47 }
0x1574   : > { %5823 = vmatprep.mubr.msk.f32.mxu0 %vm6121_vm1, %v6120_v15 }
0x1587   : > { %v3542_v48 = vpop.f32.mrf.mxu1 }
0x1588   : > { %5808 = vmatprep.mubr.msk.f32.mxu1 %vm912_vm2, %v3542_v48 }
0x1589   : > { %v5800_v49 = vpop.f32.mrf.mxu1 }
0x162f   : > { %v3618_v51 = vpop.f32.mrf.mxu0 }
0x1630   : > { %5809 = vmatmul.mubr.msk.f32.vlgmr.msra.gmra.mxu1 %vm912_vm2, %v3618_v51 }
0x1631   : > { %5817 = vmatpush3.xpose.msk.msra.mxu1 %vm912_vm2, %v3786_v50  ;;  %v5805_v20 = vpop.f32.mrf.mxu0  ;;  %5818 = vmatprep.mubr.msk.f32.mxu1 %vm6121_vm1, %v6120_v15 }
0x1632   : > { %5826 = vmatprep.subr.mxu1 %v6120_v15 }
0x1633   : > { %v3779_v53 = vpop.f32.mrf.mxu0 }
0x1634   : > { %v3861_v54 = vmul.f32 0.35355338, %v3779_v53  ;;  %5819 = vmatmul.mubr.msk.f32.vlgmr.msra.gmra.mxu1 %vm912_vm2, %v3784_v52 }
0x1635   : > { %v5815_v55 = vpop.f32.mrf.mxu0  ;;  %5828 = vmatprep.mubr.msk.f32.mxu1 %vm6121_vm1, %v6120_v15 }
0x1636   : > { %v3863_v56 = vsel %vm912_vm2, %v3861_v54, -inf }
0x1637   : > { %3864 = vmax.xlane.f32.xlu0 %v3863_v56 }
0x16c0   : > { %v3865_v57 = vpop.xlane.xlu0 %3864 }
0x16c1   : > { %v3869_v58 = vsub.f32 %v3861_v54, %v3865_v57 }
0x16c3   : > { %v3871_v59 = vmul.f32 1.442695, %v3869_v58 }
0x16c5   : > { %6068 = vpow2.f32 %v3871_v59 }
0x16d2   : > { %v6069_v60 = vpop.eup %6068 }
0x16d3   : > { %v3875_v61 = vsel %vm912_vm2, %v6069_v60, 0.0 }
0x16d4   : > { %3876 = vadd.xlane.f32.xlu0 %v3875_v61 }
0x16f0   : > { %v5810_v0 = vpop.f32.mrf.mxu1 }
0x16f1   : > { %v6640_v2 = vadd.f32 %v5810_v0, %v3289_v63 }
0x16f2   : > { %v3694_v3 = vpop.f32.mrf.mxu1 }
0x16f3   : > { %v6642_v4 = vadd.f32 %v3694_v3, %v3288_v1 }
0x16f4   : > { %v3857_v5 = vpop.f32.mrf.mxu1 }
0x16f5   : > { %v3862_v6 = vmul.f32 0.35355338, %v3857_v5  ;;  %v5346_v5 = vld [vmem:[%s6470_s0 + $0x30] sm:$0xff] }
0x16f6   : > { %v5820_v7 = vpop.f32.mrf.mxu1 }
0x16f7   : > { %v3866_v8 = vsel %vm912_vm2, %v3862_v6, -inf  ;;  %v5344_v7 = vld [vmem:[%s6470_s0 + $0x20] sm:$0xff] }
0x16f8   : > { %3867 = vmax.xlane.f32.xlu1 %v3866_v8  ;;  %v5367_v8 = vld [vmem:[%s6479_s2 + $0xf8] sm:$0xff] }
0x1709   : > { %3885 = vrot.lane.b32.xlu1 %v6537_v38, %s6960_s27 }
0x170d   : > { %4122 = vrot.lane.b32.xlu1 %v6537_v38, %s6961_s20 }
0x1711   : > { %4200 = vrot.lane.b32.xlu1 %v6541_v39, %s6961_s20 }
0x1715   : > { %4198 = vrot.lane.b32.xlu1 %v6541_v39, %s6962_s28 }
0x175d   : > { %v3877_v9 = vpop.xlane.xlu0 %3876 }
0x175e   : > { %6070 = vrcp.f32 %v3877_v9  ;;  %v5366_v9 = vld [vmem:[%s6479_s2 + $0xf0] sm:$0xff] }
0x176b   : > { %v6071_v11 = vpop.eup %6070 }
0x176c   : > { %v3883_v14 = vmul.f32 %v6071_v11, %v6069_v60  ;;  %v5364_v11 = vld [vmem:[%s6479_s2 + $0xe0] sm:$0xff] }
0x1781   : > { %v3868_v10 = vpop.xlane.xlu1 %3867 }
0x1782   : > { %v3870_v12 = vsub.f32 %v3862_v6, %v3868_v10  ;;  %v5345_v6 = vld [vmem:[%s6470_s0 + $0x28] sm:$0xff] }
0x1783   : > { %v5365_v10 = vld [vmem:[%s6479_s2 + $0xe8] sm:$0xff] }
0x1784   : > { %v3873_v16 = vmul.f32 1.442695, %v3870_v12  ;;  %v5363_v12 = vld [vmem:[%s6479_s2 + $0xd8] sm:$0xff] }
0x1785   : > { %v3886_v13 = vpop.permute.xlu1 %3885 }
0x1786   : > { %6072 = vpow2.f32 %v3873_v16  ;;  %5822 = vmatpush3.msra.mxu0 %v3886_v13  ;;  %v5362_v16 = vld [vmem:[%s6479_s2 + $0xd0] sm:$0xff]  ;;  %v5361_v13 = vld [vmem:[%s6479_s2 + $0xc8] sm:$0xff] }
0x1787   : > { %5824 = vmatmul.mubr.msk.f32.vlgmr.msra.gmra.mxu0 %vm912_vm2, %v3883_v14  ;;  %5831 = vmatprep.subr.mxu0 %v5308_v21  ;;  %v5360_v14 = vld [vmem:[%s6479_s2 + $0xc0] sm:$0xff] }
0x1788   : > { %5832 = vmatpush3.msra.mxu0 %v5308_v21  ;;  %v5357_v21 = vld [vmem:[%s6479_s2 + $0xa8] sm:$0xff] }
0x1789   : > { %5841 = vmatprep.subr.mxu0 %v6120_v15  ;;  %v4123_v26 = vpop.permute.xlu1 %4122 }
0x178d   : > { %v4201_v30 = vpop.permute.xlu1 %4200 }
0x1791   : > { %v4199_v35 = vpop.permute.xlu1 %4198 }
0x1793   : > { %v6073_v17 = vpop.eup %6072 }
0x1794   : > { %v3878_v18 = vsel %vm912_vm2, %v6073_v17, 0.0 }
0x1795   : > { %3879 = vadd.xlane.f32.xlu0 %v3878_v18  ;;  %v5358_v18 = vld [vmem:[%s6479_s2 + $0xb0] sm:$0xff] }
0x17ab   : > { %3961 = vrot.lane.b32.xlu0 %v6541_v39, %s6960_s27 }
0x17af   : > { %4120 = vrot.lane.b32.xlu0 %v6537_v38, %s6962_s28 }
0x181e   : > { %v3880_v22 = vpop.xlane.xlu0 %3879 }
0x181f   : > { %6074 = vrcp.f32 %v3880_v22  ;;  %v5356_v22 = vld [vmem:[%s6479_s2 + $0xa0] sm:$0xff] }
0x1822   : > { %v3962_v23 = vpop.permute.xlu0 %3961 }
0x1823   : > { %5827 = vmatpush3.msra.mxu1 %v3962_v23 }
0x1824   : > { %5836 = vmatprep.subr.mxu1 %v6120_v15 }
0x1826   : > { %v4121_v27 = vpop.permute.xlu0 %4120 }
0x182c   : > { %v6075_v24 = vpop.eup %6074 }
0x182d   : > { %v3884_v25 = vmul.f32 %v6075_v24, %v6073_v17  ;;  %v5359_v17 = vld [vmem:[%s6479_s2 + $0xb8] sm:$0xff] }
0x182f   : > { %5829 = vmatmul.mubr.msk.f32.vlgmr.msra.gmra.mxu1 %vm912_vm2, %v3884_v25 }
0x1830   : > { %5837 = vmatpush3.xpose.msk.msra.mxu1 %vm912_vm2, %v4123_v26  ;;  %5838 = vmatprep.mubr.msk.f32.mxu1 %vm6121_vm1, %v6120_v15 }
0x1831   : > { %5846 = vmatprep.subr.mxu1 %v6120_v15 }
0x1833   : > { %5839 = vmatmul.mubr.msk.f32.vlgmr.msra.gmra.mxu1 %vm912_vm2, %v4121_v27 }
0x1834   : > { %5848 = vmatprep.mubr.msk.f32.mxu1 %vm6121_vm1, %v6120_v15 }
0x1847   : > { %v3957_v28 = vpop.f32.mrf.mxu0 }
0x1848   : > { %5833 = vmatprep.mubr.msk.f32.mxu0 %vm912_vm2, %v3957_v28 }
0x1849   : > { %v5825_v29 = vpop.f32.mrf.mxu0 }
0x184a   : > { %v5355_v29 = vld [vmem:[%s6479_s2 + $0x98] sm:$0xff] }
0x18ef   : > { %v4033_v31 = vpop.f32.mrf.mxu1 }
0x18f0   : > { %5834 = vmatmul.mubr.msk.f32.vlgmr.msra.gmra.mxu0 %vm912_vm2, %v4033_v31  ;;  %v5353_v31 = vld [vmem:[%s6479_s2 + $0x88] sm:$0xff] }
0x18f1   : > { %5842 = vmatpush3.xpose.msk.msra.mxu0 %vm912_vm2, %v4201_v30  ;;  %v5830_v32 = vpop.f32.mrf.mxu1  ;;  %5843 = vmatprep.mubr.msk.f32.mxu0 %vm6121_vm1, %v6120_v15  ;;  %v5354_v30 = vld [vmem:[%s6479_s2 + $0x90] sm:$0xff] }
0x18f2   : > { %5851 = vmatprep.subr.mxu0 %v6120_v15  ;;  %v5352_v32 = vld [vmem:[%s6479_s2 + $0x80] sm:$0xff] }
0x18f3   : > { %v4194_v36 = vpop.f32.mrf.mxu1 }
0x18f4   : > { %v4276_v37 = vmul.f32 0.35355338, %v4194_v36  ;;  %5844 = vmatmul.mubr.msk.f32.vlgmr.msra.gmra.mxu0 %vm912_vm2, %v4199_v35 }
0x18f5   : > { %v5840_v40 = vpop.f32.mrf.mxu1  ;;  %5853 = vmatprep.mubr.msk.f32.mxu0 %vm6121_vm1, %v6120_v15 }
0x18f6   : > { %v4278_v41 = vsel %vm912_vm2, %v4276_v37, -inf }
0x18f7   : > { %4279 = vmax.xlane.f32.xlu0 %v4278_v41 }
0x1980   : > { %v4280_v42 = vpop.xlane.xlu0 %4279 }
0x1981   : > { %v4284_v43 = vsub.f32 %v4276_v37, %v4280_v42  ;;  %v5369_v42 = vld [vmem:[%s6523_s29 + $0x1] ss:$0 sm:$0xff] }
0x1983   : > { %v4286_v44 = vmul.f32 1.442695, %v4284_v43 }
0x1985   : > { %6076 = vpow2.f32 %v4286_v44 }
0x1992   : > { %v6077_v19 = vpop.eup %6076 }
0x1993   : > { %v4290_v45 = vsel %vm912_vm2, %v6077_v19, 0.0 }
0x1994   : > { %4291 = vadd.xlane.f32.xlu0 %v4290_v45 }
0x19b0   : > { %v5835_v46 = vpop.f32.mrf.mxu0 }
0x19b1   : > { %v6682_v47 = vadd.f32 %v5835_v46, %v6640_v2 }
0x19b2   : > { %v4109_v48 = vpop.f32.mrf.mxu0 }
0x19b3   : > { %v6685_v49 = vadd.f32 %v4109_v48, %v6642_v4  ;;  %v5347_v4 = vld [vmem:[%s6470_s0 + $0x38] sm:$0xff] }
0x19b4   : > { %v4272_v15 = vpop.f32.mrf.mxu0 }
0x19b5   : > { %v4277_v50 = vmul.f32 0.35355338, %v4272_v15 }
0x19b6   : > { %v5845_v51 = vpop.f32.mrf.mxu0 }
0x19b7   : > { %v4281_v20 = vsel %vm912_vm2, %v4277_v50, -inf }
0x19b8   : > { %4282 = vmax.xlane.f32.xlu1 %v4281_v20 }
0x19c9   : > { %4300 = vrot.lane.b32.xlu1 %v6537_v38, %s6963_s18  ;;  %v5309_v38 = vld [vmem:[%s6343_s1 + $0x38] sm:$0xff] }
0x1a1d   : > { %v4292_v52 = vpop.xlane.xlu0 %4291 }
0x1a1e   : > { %6078 = vrcp.f32 %v4292_v52 }
0x1a2b   : > { %v6079_v54 = vpop.eup %6078 }
0x1a2c   : > { %v4298_v58 = vmul.f32 %v6079_v54, %v6077_v19 }
0x1a41   : > { %v4283_v53 = vpop.xlane.xlu1 %4282 }
0x1a42   : > { %v4285_v55 = vsub.f32 %v4277_v50, %v4283_v53 }
0x1a44   : > { %v4288_v56 = vmul.f32 1.442695, %v4285_v55 }
0x1a45   : > { %v4301_v57 = vpop.permute.xlu1 %4300 }
0x1a46   : > { %6080 = vpow2.f32 %v4288_v56  ;;  %5847 = vmatpush3.msra.mxu1 %v4301_v57 }
0x1a47   : > { %5849 = vmatmul.mubr.msk.f32.vlgmr.msra.gmra.mxu1 %vm912_vm2, %v4298_v58  ;;  %5856 = vmatprep.subr.mxu1 %v5309_v38 }
0x1a48   : > { %5857 = vmatpush3.msra.mxu1 %v5309_v38 }
0x1a49   : > { %5872 = vmatprep.subr.mxu1 %v5367_v8 }
0x1a53   : > { %v6081_v59 = vpop.eup %6080 }
0x1a54   : > { %v4293_v60 = vsel %vm912_vm2, %v6081_v59, 0.0 }
0x1a55   : > { %4294 = vadd.xlane.f32.xlu0 %v4293_v60 }
0x1a6b   : > { %4376 = vrot.lane.b32.xlu0 %v6541_v39, %s6963_s18 }
0x1ade   : > { %v4295_v61 = vpop.xlane.xlu0 %4294 }
0x1adf   : > { %6082 = vrcp.f32 %v4295_v61 }
0x1ae2   : > { %v4377_v62 = vpop.permute.xlu0 %4376 }
0x1ae3   : > { %5852 = vmatpush3.msra.mxu0 %v4377_v62 }
0x1ae4   : > { %5861 = vmatprep.subr.mxu0 %v5347_v4 }
0x1aec   : > { %v6083_v63 = vpop.eup %6082 }
0x1aed   : > { %v4299_v0 = vmul.f32 %v6083_v63, %v6081_v59 }
0x1aef   : > { %5854 = vmatmul.mubr.msk.f32.vlgmr.msra.gmra.mxu0 %vm912_vm2, %v4299_v0 }
0x1af0   : > { %5862 = vmatpush3.msra.mxu0 %v5347_v4 }
0x1af1   : > { %5863 = vmatprep.subr.mxu0 %v5346_v5 }
0x1af2   : > { %5864 = vmatpush3.msra.mxu0 %v5346_v5 }
0x1af3   : > { %5865 = vmatprep.subr.mxu0 %v5345_v6 }
0x1af4   : > { %5866 = vmatpush3.msra.mxu0 %v5345_v6 }
0x1af5   : > { %5867 = vmatprep.subr.mxu0 %v5344_v7 }
0x1af6   : > { %5868 = vmatpush3.msra.mxu0 %v5344_v7 }
0x1b07   : > { %v4372_v1 = vpop.f32.mrf.mxu1 }
0x1b08   : > { %5858 = vmatprep.mubr.msk.f32.mxu1 %vm912_vm2, %v4372_v1 }
0x1b09   : > { %v5850_v2 = vpop.f32.mrf.mxu1 }
0x1baf   : > { %v4448_v39 = vpop.f32.mrf.mxu0 }
0x1bb0   : > { %5859 = vmatmul.mubr.msk.f32.vlgmr.msra.gmra.mxu1 %vm912_vm2, %v4448_v39 }
0x1bb1   : > { %v5855_v3 = vpop.f32.mrf.mxu0  ;;  %5873 = vmatpush3.msra.mxu1 %v5367_v8 }
0x1bb2   : > { %5874 = vmatprep.subr.mxu1 %v5366_v9 }
0x1bb3   : > { %5875 = vmatpush3.msra.mxu1 %v5366_v9 }
0x1bb4   : > { %5876 = vmatprep.subr.mxu1 %v5365_v10 }
0x1bb5   : > { %5877 = vmatpush3.msra.mxu1 %v5365_v10 }
0x1bb6   : > { %5878 = vmatprep.subr.mxu1 %v5364_v11 }
0x1bb7   : > { %5879 = vmatpush3.msra.mxu1 %v5364_v11 }
0x1bb8   : > { %5880 = vmatprep.subr.mxu1 %v5363_v12 }
0x1bb9   : > { %5881 = vmatpush3.msra.mxu1 %v5363_v12 }
0x1bba   : > { %5882 = vmatprep.subr.mxu1 %v5362_v16 }
0x1bbb   : > { %5883 = vmatpush3.msra.mxu1 %v5362_v16 }
0x1bbc   : > { %5884 = vmatprep.subr.mxu1 %v5361_v13 }
0x1bbd   : > { %5885 = vmatpush3.msra.mxu1 %v5361_v13 }
0x1bbe   : > { %5886 = vmatprep.subr.mxu1 %v5360_v14 }
0x1bbf   : > { %5887 = vmatpush3.msra.mxu1 %v5360_v14 }
0x1bc0   : > { %5888 = vmatprep.subr.mxu1 %v5359_v17 }
0x1bc1   : > { %5889 = vmatpush3.msra.mxu1 %v5359_v17 }
0x1bc2   : > { %5890 = vmatprep.subr.mxu1 %v5358_v18 }
0x1bc3   : > { %5891 = vmatpush3.msra.mxu1 %v5358_v18 }
0x1bc4   : > { %5892 = vmatprep.subr.mxu1 %v5357_v21 }
0x1bc5   : > { %5893 = vmatpush3.msra.mxu1 %v5357_v21 }
0x1bc6   : > { %5894 = vmatprep.subr.mxu1 %v5356_v22 }
0x1bc7   : > { %5895 = vmatpush3.msra.mxu1 %v5356_v22 }
0x1bc8   : > { %5896 = vmatprep.subr.mxu1 %v5355_v29 }
0x1bc9   : > { %5897 = vmatpush3.msra.mxu1 %v5355_v29 }
0x1bca   : > { %5898 = vmatprep.subr.mxu1 %v5354_v30 }
0x1bcb   : > { %5899 = vmatpush3.msra.mxu1 %v5354_v30 }
0x1bcc   : > { %5900 = vmatprep.subr.mxu1 %v5353_v31 }
0x1bcd   : > { %5901 = vmatpush3.msra.mxu1 %v5353_v31 }
0x1bce   : > { %5902 = vmatprep.subr.mxu1 %v5352_v32 }
0x1bcf   : > { %5903 = vmatpush3.msra.mxu1 %v5352_v32 }
0x1c70   : > { %v5860_v23 = vpop.f32.mrf.mxu1 }
0x1c71   : > { %v4534_v24 = vadd.f32 %v5860_v23, %v6682_v47 }
0x1c72   : > { %v4524_v25 = vpop.f32.mrf.mxu1 }
0x1c73   : > { %v4533_v26 = vadd.f32 %v4524_v25, %v6685_v49  ;;  %v4536_v28 = vadd.f32 %v4534_v24, %v6528_v34 }
0x1c75   : > { %v4535_v27 = vadd.f32 %v4533_v26, %v6526_v33  ;;  %v5349_v33 = vld [vmem:[%s6509_s22 + $0x1] ss:$0 sm:$0xff] }
0x1c77   : > { %5869 = vmatprep.mubr.msk.f32.mxu0 %vm730_vm0, %v4535_v27 }
0x1c78   : > { %5870 = vmatmul.mubr.msk.f32.vlgmr.msra.gmra.mxu0 %vm730_vm0, %v4536_v28 }
0x1d38   : > { %v5871_v35 = vpop.f32.mrf.mxu0 }
0x1d39   : > { %v4628_v34 = vadd.f32 %v5871_v35, %v5349_v33 }
0x1d3a   : > { %v4622_v36 = vpop.f32.mrf.mxu0 }
0x1d3b   : > { %v4623_v37 = vadd.f32 %v5349_v33, %v4622_v36  ;;  %v4632_v41 = vmax.f32 %v4628_v34, 0.0 }
0x1d3d   : > { %v4631_v40 = vmax.f32 %v4623_v37, 0.0 }
0x1d3f   : > { %5904 = vmatprep.mubr.f32.mxu1 %v4631_v40 }
0x1d40   : > { %5905 = vmatmul.mubr.f32.vlgmr.msra.gmra.mxu1 %v4632_v41 }
0x1e00   : > { %v5906_v43 = vpop.f32.mrf.mxu1 }
0x1e01   : > { %v4730_v44 = vadd.f32 %v5906_v43, %v5369_v42  ;;  %4738 = sbr.rel (%p5370_p4) target bundleno = 7689 (0x1e09), region = 92 }
0x1e02   : > { %v4724_v19 = vpop.f32.mrf.mxu1 }
0x1e03   : > { %v4734_v45 = vadd.f32 %v4730_v44, %v4536_v28  ;;  %v4725_v46 = vadd.f32 %v5369_v42, %v4724_v19 }
0x1e05   : > { %v4733_v47 = vadd.f32 %v4725_v46, %v4535_v27 }
0x1e06   : > { %vm4744_vm3 = vcmask 261127   ;;  %v4741_v48 = vrot.slane %v4734_v45, 7  ;;  %vm4746_vm4 = vcmask 253952  }
0x1e07   : > { %4745 = vst.msk [vmem:[#allocation2 - $0x7] sm:$0x80] %vm4744_vm3, %v4733_v47 }
0x1e08   : > { %4747 = vst.msk [vmem:[#allocation2 + $0x1] sm:$0x1] %vm4746_vm4, %v4741_v48 }
0x1e09 PF: > { %p5371_p5 = scmp.ne.s32.totalorder %s6234_s25, 1 }
0x1e0b   : > { %4751 = sbr.rel (%p5371_p5) target bundleno = 7699 (0x1e13), region = 96 }
0x1e10   : > { %vm4758_vm5 = vcmask 261127   ;;  %v4754_v49 = vrot.slane %v4734_v45, 7  ;;  %vm4760_vm6 = vcmask 253952  }
0x1e11   : > { %4759 = vst.msk [vmem:[#allocation2 - $0x5] sm:$0x80] %vm4758_vm5, %v4733_v47 }
0x1e12   : > { %4761 = vst.msk [vmem:[#allocation2 + $0x3] sm:$0x1] %vm4760_vm6, %v4754_v49 }
0x1e13 PF: > { %p5372_p6 = scmp.ne.s32.totalorder %s6234_s25, 2 }
0x1e14   : > { %s6133_s2 = smov (!%p5372_p6), 32   ;;  %s6136_s22 = smov (!%p5372_p6), 64  }
0x1e15   : > { %4765 = sbr.rel (%p5372_p6) target bundleno = 8422 (0x20e6), region = 100 }
0x1e1a   : > { %v4778_v15 = vld [vmem:[#allocation2 + $0x2] sm:$0x3]  ;;  %v4768_v50 = vrot.slane %v4734_v45, 7  ;;  %vm4772_vm7 = vcmask 261127   ;;  %vm4774_vm8 = vcmask 253952   ;;  %v4802_v51 = vld [vmem:[%s6918_s11 + $0x58] sm:$0xff] }
0x1e1b   : > { %4781 = vrot.lane.b32.xlu0 %v4778_v15, %s6133_s2  ;;  %4773 = vst.msk [vmem:[#allocation2 - $0x3] sm:$0x80] %vm4772_vm7, %v4733_v47  ;;  %v6134_v20 = vmov 0.0   ;;  %v4801_v52 = vld [vmem:[%s6918_s11 + $0x50] sm:$0xff]  ;;  %vm6135_vm9 = vmmov 0   ;;  %v4800_v53 = vld [vmem:[%s6918_s11 + $0x48] sm:$0xff] }
0x1e1c   : > { %4775 = vst.msk [vmem:[#allocation2 + $0x5] sm:$0x1] %vm4774_vm8, %v4768_v50  ;;  %5907 = vmatprep.subr.mxu0 %v6134_v20  ;;  %5934 = vmatprep.subr.mxu1 %v6134_v20  ;;  %v4896_v54 = vld [vmem:[%s6920_s13 + $0x58] sm:$0xff]  ;;  %v4895_v55 = vld [vmem:[%s6920_s13 + $0x50] sm:$0xff]  ;;  %v4799_v56 = vld [vmem:[%s6918_s11 + $0x40] sm:$0xff]  ;;  %vm4789_vm10 = vcmask 523264  }
0x1e1d   : > { %5908 = vmatpush3.msra.mxu0 %v4802_v51  ;;  %5931 = vmatprep.mubr.msk.f32.mxu0 %vm6135_vm9, %v6134_v20  ;;  %v4798_v57 = vld [vmem:[%s6918_s11 + $0x38] sm:$0xff]  ;;  %v4894_v58 = vld [vmem:[%s6920_s13 + $0x48] sm:$0xff]  ;;  %v4797_v60 = vld [vmem:[%s6918_s11 + $0x30] sm:$0xff]  ;;  %vm4810_vm11 = vcmask 785408   ;;  %vm5070_vm12 = vcmask 58368  }
0x1e1e   : > { %5909 = vmatprep.subr.mxu0 %v6134_v20  ;;  %5958 = vmatprep.mubr.msk.f32.mxu1 %vm6135_vm9, %v6134_v20  ;;  %v4893_v38 = vld [vmem:[%s6920_s13 + $0x40] sm:$0xff]  ;;  %v4796_v61 = vld [vmem:[%s6918_s11 + $0x28] sm:$0xff]  ;;  %v4892_v62 = vld [vmem:[%s6920_s13 + $0x38] sm:$0xff] }
0x1e1f   : > { %5910 = vmatpush3.msra.mxu0 %v4801_v52  ;;  %5935 = vmatpush3.msra.mxu1 %v4896_v54  ;;  %v4795_v63 = vld [vmem:[%s6918_s11 + $0x20] sm:$0xff]  ;;  %v4891_v0 = vld [vmem:[%s6920_s13 + $0x30] sm:$0xff]  ;;  %v4794_v1 = vld [vmem:[%s6918_s11 + $0x18] sm:$0xff] }
0x1e20   : > { %5911 = vmatprep.subr.mxu0 %v6134_v20  ;;  %5936 = vmatprep.subr.mxu1 %v6134_v20  ;;  %v4890_v2 = vld [vmem:[%s6920_s13 + $0x28] sm:$0xff]  ;;  %v4793_v39 = vld [vmem:[%s6918_s11 + $0x10] sm:$0xff]  ;;  %v4889_v3 = vld [vmem:[%s6920_s13 + $0x20] sm:$0xff] }
0x1e21   : > { %5912 = vmatpush3.msra.mxu0 %v4800_v53  ;;  %5937 = vmatpush3.msra.mxu1 %v4895_v55  ;;  %v4792_v4 = vld [vmem:[%s6918_s11 + $0x8] sm:$0xff]  ;;  %v4888_v5 = vld [vmem:[%s6920_s13 + $0x18] sm:$0xff]  ;;  %v4791_v6 = vld [vmem:[%s6918_s11] sm:$0xff] }
0x1e22   : > { %5913 = vmatprep.subr.mxu0 %v6134_v20  ;;  %5938 = vmatprep.subr.mxu1 %v6134_v20  ;;  %v4776_v8 = vld [vmem:[#allocation2] sm:$0x3]  ;;  %v4887_v12 = vld [vmem:[%s6920_s13 + $0x10] sm:$0xff]  ;;  %v4886_v16 = vld [vmem:[%s6920_s13 + $0x8] sm:$0xff] }
0x1e23   : > { %v4779_v59 = vld [vmem:[#allocation2 + $0x4] sm:$0x3]  ;;  %5914 = vmatpush3.msra.mxu0 %v4799_v56  ;;  %5939 = vmatpush3.msra.mxu1 %v4894_v58  ;;  %v4989_v14 = vld [vmem:[%s6922_s15 + $0x58] sm:$0xff]  ;;  %v4988_v17 = vld [vmem:[%s6922_s15 + $0x50] sm:$0xff] }
0x1e24   : > { %4785 = vrot.lane.b32.xlu0 %v4779_v59, %s6136_s22  ;;  %5915 = vmatprep.subr.mxu0 %v6134_v20  ;;  %v4885_v13 = vld [vmem:[%s6920_s13] sm:$0xff]  ;;  %v4987_v18 = vld [vmem:[%s6922_s15 + $0x48] sm:$0xff]  ;;  %v4985_v22 = vld [vmem:[%s6922_s15 + $0x38] sm:$0xff] }
0x1e25   : > { %5916 = vmatpush3.msra.mxu0 %v4798_v57  ;;  %5940 = vmatprep.subr.mxu1 %v6134_v20  ;;  %v4986_v21 = vld [vmem:[%s6922_s15 + $0x40] sm:$0xff]  ;;  %v4984_v23 = vld [vmem:[%s6922_s15 + $0x30] sm:$0xff]  ;;  %v4983_v24 = vld [vmem:[%s6922_s15 + $0x28] sm:$0xff] }
0x1e26   : > { %5917 = vmatprep.subr.mxu0 %v6134_v20  ;;  %5941 = vmatpush3.msra.mxu1 %v4893_v38  ;;  %v4982_v25 = vld [vmem:[%s6922_s15 + $0x20] sm:$0xff]  ;;  %v4981_v26 = vld [vmem:[%s6922_s15 + $0x18] sm:$0xff]  ;;  %v4980_v32 = vld [vmem:[%s6922_s15 + $0x10] sm:$0xff] }
0x1e27   : > { %5918 = vmatpush3.msra.mxu0 %v4797_v60  ;;  %5942 = vmatprep.subr.mxu1 %v6134_v20  ;;  %v5373_v27 = vld [vmem:[%s6919_s12] ss:$0 sm:$0xff]  ;;  %v4979_v33 = vld [vmem:[%s6922_s15 + $0x8] sm:$0xff] }
0x1e28   : > { %5919 = vmatprep.subr.mxu0 %v6134_v20  ;;  %5943 = vmatpush3.msra.mxu1 %v4892_v62  ;;  %v4978_v35 = vld [vmem:[%s6922_s15] sm:$0xff] }
0x1e29   : > { %5920 = vmatpush3.msra.mxu0 %v4796_v61  ;;  %5944 = vmatprep.subr.mxu1 %v6134_v20  ;;  %v5375_v34 = vld [vmem:[%s6921_s14] ss:$0 sm:$0xff] }
0x1e2a   : > { %5921 = vmatprep.subr.mxu0 %v6134_v20  ;;  %5945 = vmatpush3.msra.mxu1 %v4891_v0  ;;  %v5377_v42 = vld [vmem:[%s6923_s16] ss:$0 sm:$0xff] }
0x1e2b   : > { %5922 = vmatpush3.msra.mxu0 %v4795_v63  ;;  %5946 = vmatprep.subr.mxu1 %v6134_v20 }
0x1e2c   : > { %5923 = vmatprep.subr.mxu0 %v6134_v20  ;;  %5947 = vmatpush3.msra.mxu1 %v4890_v2 }
0x1e2d   : > { %5924 = vmatpush3.msra.mxu0 %v4794_v1  ;;  %5948 = vmatprep.subr.mxu1 %v6134_v20 }
0x1e2e   : > { %5925 = vmatprep.subr.mxu0 %v6134_v20  ;;  %5949 = vmatpush3.msra.mxu1 %v4889_v3 }
0x1e2f   : > { %5926 = vmatpush3.msra.mxu0 %v4793_v39  ;;  %5950 = vmatprep.subr.mxu1 %v6134_v20 }
0x1e30   : > { %5927 = vmatprep.subr.mxu0 %v6134_v20  ;;  %5951 = vmatpush3.msra.mxu1 %v4888_v5 }
0x1e31   : > { %5928 = vmatpush3.msra.mxu0 %v4792_v4  ;;  %5952 = vmatprep.subr.mxu1 %v6134_v20 }
0x1e32   : > { %5929 = vmatprep.subr.mxu0 %v6134_v20  ;;  %5953 = vmatpush3.msra.mxu1 %v4887_v12 }
0x1e33   : > { %5930 = vmatpush3.msra.mxu0 %v4791_v6  ;;  %5954 = vmatprep.subr.mxu1 %v6134_v20 }
0x1e34   : > { %5961 = vmatprep.subr.mxu0 %v6134_v20  ;;  %5955 = vmatpush3.msra.mxu1 %v4886_v16 }
0x1e35   : > { %5956 = vmatprep.subr.mxu1 %v6134_v20 }
0x1e36   : > { %5957 = vmatpush3.msra.mxu1 %v4885_v13 }
0x1e8d   : > { %v4782_v7 = vpop.permute.xlu0 %4781 }
0x1e8e   : > { %v4788_v9 = vsel %vm730_vm0, %v4776_v8, %v4782_v7 }
0x1e96   : > { %v4786_v10 = vpop.permute.xlu0 %4785 }
0x1e97   : > { %v4790_v11 = vsel %vm4789_vm10, %v4788_v9, %v4786_v10 }
0x1e98   : > { %5932 = vmatmul.mubr.msk.f32.vlgmr.msra.gmra.mxu0 %vm4810_vm11, %v4790_v11 }
0x1e99   : > { %5985 = vmatprep.mubr.msk.f32.mxu0 %vm6135_vm9, %v6134_v20  ;;  %5962 = vmatpush3.msra.mxu0 %v4989_v14 }
0x1e9a   : > { %5963 = vmatprep.subr.mxu0 %v6134_v20 }
0x1e9b   : > { %5964 = vmatpush3.msra.mxu0 %v4988_v17 }
0x1e9c   : > { %5965 = vmatprep.subr.mxu0 %v6134_v20 }
0x1e9d   : > { %5966 = vmatpush3.msra.mxu0 %v4987_v18 }
0x1e9e   : > { %5967 = vmatprep.subr.mxu0 %v6134_v20 }
0x1e9f   : > { %5968 = vmatpush3.msra.mxu0 %v4986_v21 }
0x1ea0   : > { %5969 = vmatprep.subr.mxu0 %v6134_v20 }
0x1ea1   : > { %5970 = vmatpush3.msra.mxu0 %v4985_v22 }
0x1ea2   : > { %5971 = vmatprep.subr.mxu0 %v6134_v20 }
0x1ea3   : > { %5972 = vmatpush3.msra.mxu0 %v4984_v23 }
0x1ea4   : > { %5973 = vmatprep.subr.mxu0 %v6134_v20 }
0x1ea5   : > { %5974 = vmatpush3.msra.mxu0 %v4983_v24 }
0x1ea6   : > { %5975 = vmatprep.subr.mxu0 %v6134_v20 }
0x1ea7   : > { %5976 = vmatpush3.msra.mxu0 %v4982_v25 }
0x1ea8   : > { %5977 = vmatprep.subr.mxu0 %v6134_v20 }
0x1ea9   : > { %5978 = vmatpush3.msra.mxu0 %v4981_v26 }
0x1eaa   : > { %5979 = vmatprep.subr.mxu0 %v6134_v20 }
0x1eab   : > { %5980 = vmatpush3.msra.mxu0 %v4980_v32 }
0x1eac   : > { %5981 = vmatprep.subr.mxu0 %v6134_v20 }
0x1ead   : > { %5982 = vmatpush3.msra.mxu0 %v4979_v33 }
0x1eae   : > { %5983 = vmatprep.subr.mxu0 %v6134_v20 }
0x1eaf   : > { %5984 = vmatpush3.msra.mxu0 %v4978_v35 }
0x1f58   : > { %v4880_v28 = vpop.f32.mrf.mxu0 }
0x1f59   : > { %v4881_v29 = vadd.f32 %v5373_v27, %v4880_v28 }
0x1f5a   : > { %v5933_v30 = vpop.f32.mrf.mxu0 }
0x1f5b   : > { %v4884_v31 = vmax.f32 %v4881_v29, 0.0 }
0x1f5d   : > { %5959 = vmatmul.mubr.msk.f32.vlgmr.msra.gmra.mxu1 %vm4810_vm11, %v4884_v31 }
0x201d   : > { %v4973_v36 = vpop.f32.mrf.mxu1 }
0x201e   : > { %v4974_v37 = vadd.f32 %v5375_v34, %v4973_v36 }
0x201f   : > { %v5960_v40 = vpop.f32.mrf.mxu1 }
0x2020   : > { %v4977_v41 = vadd.f32 %v4974_v37, %v4790_v11 }
0x2022   : > { %5986 = vmatmul.mubr.msk.f32.vlgmr.msra.gmra.mxu0 %vm4810_vm11, %v4977_v41 }
0x20e2   : > { %v5066_v43 = vpop.f32.mrf.mxu0 }
0x20e3   : > { %v5067_v44 = vadd.f32 %v5377_v42, %v5066_v43 }
0x20e4   : > { %v5987_v19 = vpop.f32.mrf.mxu0 }
0x20e5   : > { %5071 = vst.msk [vmem:[#allocation3] sm:$0x3] %vm5070_vm12, %v5067_v44 }
0x20e6 PF: > { %p5992_p7 = scmp.eq.s32.totalorder %s6234_s25, 2  ;;  %s6137_s27 = smov [#allocation3]  }
0x20e7   : > { %s5079_s20 = sshll.u32 %s6137_s27, 4  ;;  %s5080_s20 = int_to_ptr.vmem [resolvable:$true] %s5079_s20 }
0x20e8   : > { %s6084_s28 = scalar_lea.vmem %s5080_s20, 32  ;;  %p6091_p11 = scmp.lt.s32.totalorder %s5080_s20, %s5080_s20 }
0x20e9   : > { %p6085_p8 = scmp.ne.s32.totalorder %s5080_s20, %s6084_s28  ;;  %p6092_p12 = scmp.lt.s32.totalorder %s6084_s28, %s6084_s28 }
0x20eb   : > { %p6086_p9 = pnand %p6085_p8, %p5992_p7  ;;  %p6093_p13 = por %p6092_p12, %p6091_p11 }
0x20ed   : > { %p6087_p10 = pneg %p6086_p9 }
0x20ef   : > { %p6094_p0 = pnand %p6093_p13, %p6087_p10 }
0x20f1   : > { %6097 = shalt.err (!%p6094_p0)
}
0x20f2   : > { %5989 = dma.vmem_to_hbm [thread:$0]  (%p5992_p7), %s5080_s20, 32, %s6924_s17, [#allocation4]  }
0x20f3   : > { %6113 = dma.done.wait (%p5992_p7), [#allocation4], 32  }
0x20f4   : > { %6115 = vsyncadd (%p5992_p7), [#allocation4], 4294967264 }
0x20f5 PF: > { %s28_s24 = sadd.s32 1, %s6118_s24  }
0x20f6   : > { %p25_p1 = scmp.ge.s32.totalorder %s28_s24, 5  }
0x20f8   :  { %27 = sbr.rel (!%p25_p1) target bundleno = 5 (0x5), region = 168 }
0x20fd   :  { %5092 = vsyncpa [#allocation4], 1 }
0x20fe   :  { %5094 = vsyncpa [#allocation4 + $0x1], 1 }

</bundles_post_ra>
